<compile_context>
chip_gen: v7x
topology: tpu7x:2x2x1
jax: 0.10.0
libtpu: 0.0.40
codegen_flags: <defaults>
</compile_context>

<pallas_src>
import math

import jax
import jax.numpy as jnp
from jax.experimental import pallas as pl
from jax.experimental.pallas import tpu as pltpu


def _round_up(n, m):
    return ((n + m - 1) // m) * m


# ---------------------------------------------------------------------------
# Kernel body
# ---------------------------------------------------------------------------
def _disc_kernel(xt_ref, w1_ref, b1_ref, w2_ref, b2_ref,
                 w3_ref, b3_ref, w4_ref, b4_ref, o_ref):
    # xt_ref: (2, T) f32   — batch on lanes
    # w1: (256, 2)   b1: (256, 1)
    # w2: (128, 256) b2: (128, 1)   (bf16 weights by default)
    # w3: (64, 128)  b3: (64, 1)
    # w4: (64, 1)    b4: (1, 1)
    xt = xt_ref[...]                                     # (2, T) f32
    w1 = w1_ref[...]                                     # (256, 2) f32

    # ---- Linear(2, 256) + ReLU : K=2 -> pure VPU broadcast FMAs (skip MXU) ----
    h = (w1[:, 0:1] * xt[0:1, :]
         + w1[:, 1:2] * xt[1:2, :]
         + b1_ref[...])                                  # (256, T) f32
    # ReLU in f32, then pack to the matmul operand dtype (bf16) in one step so
    # only the narrow copy of the largest intermediate stays live.
    h = jnp.maximum(h, 0.0).astype(w2_ref.dtype)         # (256, T)
    # Dropout(0.3): identity in eval mode.

    # ---- Linear(256, 128) + ReLU : MXU (bf16 operands, f32 accumulation) ----
    h = jnp.dot(w2_ref[...], h,
                preferred_element_type=jnp.float32) + b2_ref[...]   # (128, T) f32
    h = jnp.maximum(h, 0.0).astype(w3_ref.dtype)         # (128, T)
    # Dropout(0.3): identity in eval mode.

    # ---- Linear(128, 64) + ReLU : MXU ----
    h = jnp.dot(w3_ref[...], h,
                preferred_element_type=jnp.float32) + b3_ref[...]   # (64, T) f32
    h = jnp.maximum(h, 0.0)
    # Dropout(0.3): identity in eval mode.

    # ---- Linear(64, 1) : N=1 -> VPU multiply + sublane reduce (skip MXU) ----
    logits = jnp.sum(h * w4_ref[...], axis=0, keepdims=True) + b4_ref[...]  # (1, T)

    # ---- Sigmoid : exp + approx reciprocal both live in the idle EUP slot ----
    probs = pl.reciprocal(1.0 + jnp.exp(-logits), approx=True)
    # approx reciprocal can overshoot 1/(1+e^-x) by a few ULPs; clamp to [0,1].
    probs = jnp.clip(probs, 0.0, 1.0)
    o_ref[...] = probs.astype(o_ref.dtype)


# ---------------------------------------------------------------------------
# Generation-aware tiling
# ---------------------------------------------------------------------------
_PER_ELEM_VMEM_BYTES = 3 * 1024       # conservative live working set / batch row


def _tpu_generation():
    try:
        kind = jax.devices()[0].device_kind.lower()
    except Exception:
        kind = ""
    if "v5 lite" in kind or "v5e" in kind or "v5lite" in kind:
        return "v5e"
    if "v6" in kind:
        return "v6e"
    if "v7" in kind:
        return "v7x"
    return "unknown"


def _gen_config(gen):
    # (num_tensorcores, max_tile_rows, scoped_vmem_default, vmem_cap_for_limit)
    if gen == "v5e":
        return 1, 16384, 16 << 20, 100 << 20
    if gen == "v6e":
        return 1, 16384, 32 << 20, 100 << 20
    if gen == "v7x":
        return 2, 8192, 32 << 20, 48 << 20
    # Unknown: assume 2 cores + smaller VMEM (safe on every generation).
    return 2, 8192, 32 << 20, 48 << 20


def _choose_tiling(B, *, max_tile, num_cores):
    """Pick (tile, grid_len, Bp): as few grid steps as possible, grid a
    multiple of num_cores when the batch is big enough to split."""
    Bp = _round_up(max(B, 1), 128)
    if num_cores > 1 and Bp > 128:
        per_core = _round_up(pl.cdiv(Bp, num_cores), 128)
        tile = min(max_tile, per_core)
    else:
        tile = min(max_tile, Bp)
    tile = max(128, _round_up(tile, 128))
    grid_len = pl.cdiv(Bp, tile)
    if num_cores > 1 and grid_len > 1 and grid_len % num_cores != 0:
        grid_len = _round_up(grid_len, num_cores)
    Bp = grid_len * tile
    return tile, grid_len, Bp


# ---------------------------------------------------------------------------
# Slab-level forward: feature-major in, feature-major out, no layout plumbing.
# ---------------------------------------------------------------------------
def discriminator_forward_t(xt, params, *, use_bf16_matmul=True):
    """xt: (2, Bp) float32, Bp a multiple of 128 (feature-major, batch on lanes).

    Returns a (1, Bp) float32 slab of probabilities. Use this entry point when
    the producer/consumer can already work in the transposed layout (avoids the
    wrapper-side transpose/pad/reshape ops entirely).
    """
    f_in, Bp = xt.shape
    assert f_in == 2 and Bp % 128 == 0, "xt must be (2, multiple of 128)"

    gen = _tpu_generation()
    num_cores, max_tile, scoped_default, vmem_cap = _gen_config(gen)
    tile, grid_len, Bp2 = _choose_tiling(Bp, max_tile=max_tile, num_cores=num_cores)
    assert Bp2 >= Bp
    if Bp2 != Bp:
        xt = jnp.pad(xt, ((0, 0), (0, Bp2 - Bp)))
    Bp = Bp2

    w1, b1 = params["w1"], params["b1"]                  # (256, 2),   (256, 1)
    w2, b2 = params["w2"], params["b2"]                  # (128, 256), (128, 1)
    w3, b3 = params["w3"], params["b3"]                  # (64, 128),  (64, 1)
    w4, b4 = params["w4"], params["b4"]                  # (1, 64),    (1, 1)
    w4c = w4.T                                           # (64, 1) column for VPU reduce

    if use_bf16_matmul:
        # Halves MXU passes and weight bytes; f32 accumulation kept.
        w2 = w2.astype(jnp.bfloat16)
        w3 = w3.astype(jnp.bfloat16)

    def full(arr):
        # Whole array, same block every grid step (weights resident in VMEM).
        return pl.BlockSpec(arr.shape, lambda i: (0, 0))

    # Raise the scoped-VMEM limit if the chosen tile needs it (v5e defaults to
    # 16 MiB; one 16k-row tile on v5e/v6e needs ~50 MiB).
    weight_bytes = sum(int(a.size) * a.dtype.itemsize
                       for a in (w1, b1, w2, b2, w3, b3, w4c, b4))
    vmem_needed = int(tile * _PER_ELEM_VMEM_BYTES * 1.25) + weight_bytes + (1 << 20)
    vmem_limit = int(min(vmem_cap, max(scoped_default, vmem_needed)))

    # Advisory cost: this call is tiny relative to surrounding GAN-step work.
    flops_per_row = 2 * (2 * 256 + 256 * 128 + 128 * 64 + 64 * 1)    # 83072
    cost = pl.CostEstimate(
        flops=flops_per_row * Bp,
        transcendentals=Bp,
        bytes_accessed=12 * Bp + weight_bytes,
    )

    out = pl.pallas_call(
        _disc_kernel,
        out_shape=jax.ShapeDtypeStruct((1, Bp), jnp.float32),
        grid_spec=pltpu.PrefetchScalarGridSpec(
            num_scalar_prefetch=0,
            grid=(grid_len,),
            in_specs=[
                pl.BlockSpec((2, tile), lambda i: (0, i)),    # x^T tile (lane-dense)
                full(w1), full(b1),
                full(w2), full(b2),
                full(w3), full(b3),
                full(w4c), full(b4),
            ],
            out_specs=pl.BlockSpec((1, tile), lambda i: (0, i)),  # lane-dense output
        ),
        compiler_params=pltpu.CompilerParams(
            dimension_semantics=("parallel",),
            vmem_limit_bytes=vmem_limit,
        ),
        cost_estimate=cost,
    )(xt, w1, b1, w2, b2, w3, b3, w4c, b4)

    return out


# ---------------------------------------------------------------------------
# PyTorch-shaped convenience wrapper: (B, 2) -> (B, 1)
# ---------------------------------------------------------------------------
def discriminator_forward(x, params, *, use_bf16_matmul=True):
    """x: (B, 2) float32. params: PyTorch-layout weights w1..w4 (out,in), b1..b4 (out,1).

    Returns (B, 1) float32, matching the PyTorch module's output shape.
    (For the fastest path at small B, use discriminator_forward_t directly and
    keep the feature-major layout upstream/downstream.)
    """
    B, f_in = x.shape
    assert f_in == 2
    Bp = _round_up(B, 128)
    xt = x.T                                             # (2, B), batch on lanes
    if Bp != B:
        xt = jnp.pad(xt, ((0, 0), (0, Bp - B)))
    out = discriminator_forward_t(xt, params, use_bf16_matmul=use_bf16_matmul)
    return out[0, :B].reshape(B, 1)


# ---------------------------------------------------------------------------
# Params & reference
# ---------------------------------------------------------------------------
def init_params(key):
    """PyTorch nn.Linear default init: U(-1/sqrt(fan_in), +), weights (out, in)."""
    dims = [(2, 256), (256, 128), (128, 64), (64, 1)]
    params = {}
    for idx, (fan_in, fan_out) in enumerate(dims, start=1):
        key, kw, kb = jax.random.split(key, 3)
        bound = 1.0 / math.sqrt(fan_in)
        params[f"w{idx}"] = jax.random.uniform(
            kw, (fan_out, fan_in), jnp.float32, -bound, bound)
        params[f"b{idx}"] = jax.random.uniform(
            kb, (fan_out, 1), jnp.float32, -bound, bound)
    return params


def reference_forward(x, params):
    """Pure-JAX f32 reference of the PyTorch forward (dropout = identity)."""
    h = jnp.maximum(x @ params["w1"].T + params["b1"][:, 0], 0.0)
    h = jnp.maximum(h @ params["w2"].T + params["b2"][:, 0], 0.0)
    h = jnp.maximum(h @ params["w3"].T + params["b3"][:, 0], 0.0)
    logits = h @ params["w4"].T + params["b4"][:, 0]
    return jax.nn.sigmoid(logits)                        # (B, 1)


if __name__ == "__main__":
    key = jax.random.PRNGKey(0)
    key_p, key_x = jax.random.split(key)

    params = init_params(key_p)

    B = 1000  # non-multiple of 128 -> exercises padding; splits into 2 tiles on v7x
    x = jax.random.normal(key_x, (B, 2), jnp.float32)

    out = discriminator_forward(x, params, use_bf16_matmul=True)
    out = jax.block_until_ready(out)

    assert out.shape == (B, 1)
    assert bool(jnp.all(jnp.isfinite(out)))
    assert bool(jnp.all((out >= 0.0) & (out <= 1.0)))

    ref = reference_forward(x, params)
    max_err = float(jnp.max(jnp.abs(out - ref)))
    assert max_err < 5e-2, f"mismatch vs reference, max abs err {max_err}"

    print("KERNEL_OK")
</pallas_src>

<mosaic_0001>
module attributes {stable_mosaic.version = 11 : i64} {
  func.func @_disc_kernel(%arg0: i32, %arg1: memref<2x512xf32, #tpu.memory_space<vmem>>, %arg2: memref<256x2xf32, #tpu.memory_space<vmem>>, %arg3: memref<256x1xf32, #tpu.memory_space<vmem>>, %arg4: memref<128x256xbf16, #tpu.memory_space<vmem>>, %arg5: memref<128x1xf32, #tpu.memory_space<vmem>>, %arg6: memref<64x128xbf16, #tpu.memory_space<vmem>>, %arg7: memref<64x1xf32, #tpu.memory_space<vmem>>, %arg8: memref<64x1xf32, #tpu.memory_space<vmem>>, %arg9: memref<1x1xf32, #tpu.memory_space<vmem>>, %arg10: memref<1x512xf32, #tpu.memory_space<vmem>>) attributes {dimension_semantics = [#tpu.dimension_semantics<parallel>], iteration_bounds = array<i64: 2>, scalar_prefetch = 0 : i64, scratch_operands = 0 : i64, tpu.core_type = #tpu.core_type<tc>, window_params = [{transform_indices = @transform_0, window_bounds = array<i64: 2, 512>}, {pipeline_mode = #tpu.pipeline_mode<synchronous>, transform_indices = @transform_1, window_bounds = array<i64: 256, 2>}, {pipeline_mode = #tpu.pipeline_mode<synchronous>, transform_indices = @transform_2, window_bounds = array<i64: 256, 1>}, {pipeline_mode = #tpu.pipeline_mode<synchronous>, transform_indices = @transform_3, window_bounds = array<i64: 128, 256>}, {pipeline_mode = #tpu.pipeline_mode<synchronous>, transform_indices = @transform_4, window_bounds = array<i64: 128, 1>}, {pipeline_mode = #tpu.pipeline_mode<synchronous>, transform_indices = @transform_5, window_bounds = array<i64: 64, 128>}, {pipeline_mode = #tpu.pipeline_mode<synchronous>, transform_indices = @transform_6, window_bounds = array<i64: 64, 1>}, {pipeline_mode = #tpu.pipeline_mode<synchronous>, transform_indices = @transform_7, window_bounds = array<i64: 64, 1>}, {pipeline_mode = #tpu.pipeline_mode<synchronous>, transform_indices = @transform_8, window_bounds = array<i64: 1, 1>}, {transform_indices = @transform_9, window_bounds = array<i64: 1, 512>}]} {
    %c0 = arith.constant 0 : index
    %c0_0 = arith.constant 0 : index
    %0 = vector.load %arg1[%c0, %c0_0] : memref<2x512xf32, #tpu.memory_space<vmem>>, vector<2x512xf32>
    %c0_1 = arith.constant 0 : index
    %c0_2 = arith.constant 0 : index
    %1 = vector.load %arg2[%c0_1, %c0_2] : memref<256x2xf32, #tpu.memory_space<vmem>>, vector<256x2xf32>
    %2 = vector.extract_strided_slice %1 {offsets = [0, 0], sizes = [256, 1], strides = [1, 1]} : vector<256x2xf32> to vector<256x1xf32>
    %3 = vector.extract_strided_slice %0 {offsets = [0, 0], sizes = [1, 512], strides = [1, 1]} : vector<2x512xf32> to vector<1x512xf32>
    %4 = vector.broadcast %2 : vector<256x1xf32> to vector<256x512xf32>
    %5 = vector.broadcast %3 : vector<1x512xf32> to vector<256x512xf32>
    %6 = arith.mulf %4, %5 : vector<256x512xf32>
    %7 = vector.extract_strided_slice %1 {offsets = [0, 1], sizes = [256, 1], strides = [1, 1]} : vector<256x2xf32> to vector<256x1xf32>
    %8 = vector.extract_strided_slice %0 {offsets = [1, 0], sizes = [1, 512], strides = [1, 1]} : vector<2x512xf32> to vector<1x512xf32>
    %9 = vector.broadcast %7 : vector<256x1xf32> to vector<256x512xf32>
    %10 = vector.broadcast %8 : vector<1x512xf32> to vector<256x512xf32>
    %11 = arith.mulf %9, %10 : vector<256x512xf32>
    %12 = arith.addf %6, %11 : vector<256x512xf32>
    %c0_3 = arith.constant 0 : index
    %c0_4 = arith.constant 0 : index
    %13 = vector.load %arg3[%c0_3, %c0_4] : memref<256x1xf32, #tpu.memory_space<vmem>>, vector<256x1xf32>
    %14 = vector.broadcast %13 : vector<256x1xf32> to vector<256x512xf32>
    %15 = arith.addf %12, %14 : vector<256x512xf32>
    %cst = arith.constant 0.000000e+00 : f32
    %16 = vector.broadcast %cst : f32 to vector<256x512xf32>
    %17 = arith.maximumf %15, %16 : vector<256x512xf32>
    %18 = arith.truncf %17 : vector<256x512xf32> to vector<256x512xbf16>
    %c0_5 = arith.constant 0 : index
    %c0_6 = arith.constant 0 : index
    %19 = vector.load %arg4[%c0_5, %c0_6] : memref<128x256xbf16, #tpu.memory_space<vmem>>, vector<128x256xbf16>
    %cst_7 = arith.constant dense<0.000000e+00> : vector<128x512xf32>
    %20 = tpu.matmul %19, %18, %cst_7 {dimension_numbers = #tpu.dot_dimension_numbers<[1], [0], [0], [1], [0, 0, 1, 1], [], []>} : vector<128x256xbf16>, vector<256x512xbf16>, vector<128x512xf32> -> vector<128x512xf32>
    %c0_8 = arith.constant 0 : index
    %c0_9 = arith.constant 0 : index
    %21 = vector.load %arg5[%c0_8, %c0_9] : memref<128x1xf32, #tpu.memory_space<vmem>>, vector<128x1xf32>
    %22 = vector.broadcast %21 : vector<128x1xf32> to vector<128x512xf32>
    %23 = arith.addf %20, %22 : vector<128x512xf32>
    %cst_10 = arith.constant 0.000000e+00 : f32
    %24 = vector.broadcast %cst_10 : f32 to vector<128x512xf32>
    %25 = arith.maximumf %23, %24 : vector<128x512xf32>
    %26 = arith.truncf %25 : vector<128x512xf32> to vector<128x512xbf16>
    %c0_11 = arith.constant 0 : index
    %c0_12 = arith.constant 0 : index
    %27 = vector.load %arg6[%c0_11, %c0_12] : memref<64x128xbf16, #tpu.memory_space<vmem>>, vector<64x128xbf16>
    %cst_13 = arith.constant dense<0.000000e+00> : vector<64x512xf32>
    %28 = tpu.matmul %27, %26, %cst_13 {dimension_numbers = #tpu.dot_dimension_numbers<[1], [0], [0], [1], [0, 0, 1, 1], [], []>} : vector<64x128xbf16>, vector<128x512xbf16>, vector<64x512xf32> -> vector<64x512xf32>
    %c0_14 = arith.constant 0 : index
    %c0_15 = arith.constant 0 : index
    %29 = vector.load %arg7[%c0_14, %c0_15] : memref<64x1xf32, #tpu.memory_space<vmem>>, vector<64x1xf32>
    %30 = vector.broadcast %29 : vector<64x1xf32> to vector<64x512xf32>
    %31 = arith.addf %28, %30 : vector<64x512xf32>
    %cst_16 = arith.constant 0.000000e+00 : f32
    %32 = vector.broadcast %cst_16 : f32 to vector<64x512xf32>
    %33 = arith.maximumf %31, %32 : vector<64x512xf32>
    %c0_17 = arith.constant 0 : index
    %c0_18 = arith.constant 0 : index
    %34 = vector.load %arg8[%c0_17, %c0_18] : memref<64x1xf32, #tpu.memory_space<vmem>>, vector<64x1xf32>
    %35 = vector.broadcast %34 : vector<64x1xf32> to vector<64x512xf32>
    %36 = arith.mulf %33, %35 : vector<64x512xf32>
    %cst_19 = arith.constant dense<0.000000e+00> : vector<512xf32>
    %37 = vector.multi_reduction <add>, %36, %cst_19 [0] : vector<64x512xf32> to vector<512xf32>
    %38 = vector.shape_cast %37 : vector<512xf32> to vector<1x512xf32>
    %c0_20 = arith.constant 0 : index
    %c0_21 = arith.constant 0 : index
    %39 = vector.load %arg9[%c0_20, %c0_21] : memref<1x1xf32, #tpu.memory_space<vmem>>, vector<1x1xf32>
    %40 = vector.broadcast %39 : vector<1x1xf32> to vector<1x512xf32>
    %41 = arith.addf %38, %40 : vector<1x512xf32>
    %cst_22 = arith.constant 0.000000e+00 : f32
    %42 = vector.broadcast %cst_22 : f32 to vector<1x512xf32>
    %43 = arith.subf %42, %41 : vector<1x512xf32>
    %44 = math.exp %43 : vector<1x512xf32>
    %cst_23 = arith.constant 1.000000e+00 : f32
    %45 = vector.broadcast %cst_23 : f32 to vector<1x512xf32>
    %46 = arith.addf %45, %44 : vector<1x512xf32>
    %47 = tpu.reciprocal %46 {approx = true} : vector<1x512xf32> -> vector<1x512xf32>
    %cst_24 = arith.constant 0.000000e+00 : f32
    %cst_25 = arith.constant 1.000000e+00 : f32
    %48 = vector.broadcast %cst_24 : f32 to vector<1x512xf32>
    %49 = arith.maximumf %48, %47 : vector<1x512xf32>
    %50 = vector.broadcast %cst_25 : f32 to vector<1x512xf32>
    %51 = arith.minimumf %50, %49 : vector<1x512xf32>
    %c0_26 = arith.constant 0 : index
    %c0_27 = arith.constant 0 : index
    %52 = vector.load %arg10[%c0_26, %c0_27] : memref<1x512xf32, #tpu.memory_space<vmem>>, vector<1x512xf32>
    tpu.vector_store %arg10[%c0_26, %c0_27], %51 {strides = array<i32>} : memref<1x512xf32, #tpu.memory_space<vmem>>, vector<1x512xf32>,
    return
  }
  func.func @transform_0(%arg0: i32) -> (i32, i32) {
    %c0_i32 = arith.constant 0 : i32
    %c0_i32_0 = arith.constant 0 : i32
    return %c0_i32, %arg0 : i32, i32
  }
  func.func @transform_1(%arg0: i32) -> (i32, i32) {
    %c0_i32 = arith.constant 0 : i32
    %c0_i32_0 = arith.constant 0 : i32
    %c0_i32_1 = arith.constant 0 : i32
    return %c0_i32, %c0_i32_0 : i32, i32
  }
  func.func @transform_2(%arg0: i32) -> (i32, i32) {
    %c0_i32 = arith.constant 0 : i32
    %c0_i32_0 = arith.constant 0 : i32
    %c0_i32_1 = arith.constant 0 : i32
    return %c0_i32, %c0_i32_0 : i32, i32
  }
  func.func @transform_3(%arg0: i32) -> (i32, i32) {
    %c0_i32 = arith.constant 0 : i32
    %c0_i32_0 = arith.constant 0 : i32
    %c0_i32_1 = arith.constant 0 : i32
    return %c0_i32, %c0_i32_0 : i32, i32
  }
  func.func @transform_4(%arg0: i32) -> (i32, i32) {
    %c0_i32 = arith.constant 0 : i32
    %c0_i32_0 = arith.constant 0 : i32
    %c0_i32_1 = arith.constant 0 : i32
    return %c0_i32, %c0_i32_0 : i32, i32
  }
  func.func @transform_5(%arg0: i32) -> (i32, i32) {
    %c0_i32 = arith.constant 0 : i32
    %c0_i32_0 = arith.constant 0 : i32
    %c0_i32_1 = arith.constant 0 : i32
    return %c0_i32, %c0_i32_0 : i32, i32
  }
  func.func @transform_6(%arg0: i32) -> (i32, i32) {
    %c0_i32 = arith.constant 0 : i32
    %c0_i32_0 = arith.constant 0 : i32
    %c0_i32_1 = arith.constant 0 : i32
    return %c0_i32, %c0_i32_0 : i32, i32
  }
  func.func @transform_7(%arg0: i32) -> (i32, i32) {
    %c0_i32 = arith.constant 0 : i32
    %c0_i32_0 = arith.constant 0 : i32
    %c0_i32_1 = arith.constant 0 : i32
    return %c0_i32, %c0_i32_0 : i32, i32
  }
  func.func @transform_8(%arg0: i32) -> (i32, i32) {
    %c0_i32 = arith.constant 0 : i32
    %c0_i32_0 = arith.constant 0 : i32
    %c0_i32_1 = arith.constant 0 : i32
    return %c0_i32, %c0_i32_0 : i32, i32
  }
  func.func @transform_9(%arg0: i32) -> (i32, i32) {
    %c0_i32 = arith.constant 0 : i32
    %c0_i32_0 = arith.constant 0 : i32
    return %c0_i32, %arg0 : i32, i32
  }
}

</mosaic_0001>

<bundles_post_ra>
// kernel: tpu_custom_call.1
= control target key start
LH: loop header
LB: loop body
LE: loop exit
PB: predicated region body
PF: predicated region fallthrough
CT: control target
= control target key end

     0   :  { %s4246_s0 = inlined_call_operand.vmem [shape: f32[2,1024], index: 0, kind: input, shape index: {}]   ;;  %s4247_s1 = inlined_call_operand.vmem [shape: f32[256,2], index: 1, kind: input, shape index: {}]   ;;  %s4248_s2 = inlined_call_operand.vmem [shape: f32[256,1], index: 2, kind: input, shape index: {}]   ;;  %s4249_s3 = inlined_call_operand.vmem [shape: bf16[128,256], index: 3, kind: input, shape index: {}]   ;;  %s4250_s4 = inlined_call_operand.vmem [shape: f32[128,1], index: 4, kind: input, shape index: {}]   ;;  %s4251_s5 = inlined_call_operand.vmem [shape: bf16[64,128], index: 5, kind: input, shape index: {}]   ;;  %s4252_s6 = inlined_call_operand.vmem [shape: f32[64,1], index: 6, kind: input, shape index: {}]   ;;  %s4253_s7 = inlined_call_operand.vmem [shape: f32[64,1], index: 7, kind: input, shape index: {}]   ;;  %s4254_s8 = inlined_call_operand.<no memory space> [shape: f32[1,1], index: 8, kind: input, shape index: {}]   ;;  %s4255_s9 = inlined_call_operand.hbm [shape: f32[1,1024], index: 9, kind: output, shape index: {}]  }
   0x1   :  { %v14_v0 = vstv %s4254_s8 }
   0x2   :  { %15 = vst [vmem:[#allocation2] sm:$0x1] %v14_v0 }
   0x3   :  { %16 = vsyncpa [#allocation4], 0 }
   0x4   :  { %18 = vsyncpa [#allocation4 + $0x1], 0  ;;  %s2957_s11 = smov 0   ;;  %s2959_s12 = smov 0  }
   0x5   :  { %s2961_s13 = smov 0   ;;  %s2963_s14 = smov 0  }
   0x6 LB: > { %s2978_s8 = sadd.s32 4294967295, %s2898_s14   ;;  %s2681_s15 = sadd.s32 4294967294, %s2898_s14   ;;  %s2898_s14 = sphi %s2963_s14, %s4333_s14   ;;  %s2894_s13 = sphi %s2961_s13, %s4332_s13   ;;  %s2890_s12 = sphi %s2959_s12, %s4331_s12   ;;  %s2886_s11 = sphi %s2957_s11, %s4330_s11  }
   0x7   : > { %s2982_s16 = sadd.s32 1, %s2898_s14   ;;  %s225_s17 = sadd.s32 1, %s2894_s13 }
   0x8   : > { %s222_s18 = ssub.s32 %s2898_s14, %s2982_s16  ;;  %p235_p0 = scmp.ne.s32.totalorder %s2894_s13, %s2890_s12 }
   0x9   : > { %p223_p1 = scmp.eq.s32.totalorder %s222_s18, 0  ;;  %p236_p2 = scmp.eq.s32.totalorder %s2978_s8, 1 }
   0xa   : > { %p241_p3 = scmp.ne.s32.totalorder %s2890_s12, %s2886_s11  ;;  %p242_p4 = scmp.eq.s32.totalorder %s2681_s15, 1 }
   0xb   : > { %s2993_s19 = scalar_select %p223_p1, %s2894_s13, %s225_s17  }
   0xc   : > { %p2995_p5 = por %p236_p2, %p235_p0  ;;  %p2999_p6 = por %p242_p4, %p241_p3 }
   0xd   : > { %p2684_p7 = scmp.ge.s32.totalorder %s2898_s14, 1  ;;  %p293_p8 = scmp.lt.s32.totalorder %s2898_s14, 3 }
   0xf   : > { %p294_p9 = pnand %p2684_p7, %p293_p8 }
  0x11   : > { %297 = sbr.rel (%p294_p9) target bundleno = 1044 (0x414), region = 56 }
  0x18   : > { %v3008_v1 = vld [vmem:[%s4247_s1 + $0x10] sm:$0xff]  ;;  %v3013_v2 = vld [vmem:[%s4247_s1] sm:$0xff]  ;;  %v4257_v3 = vmov 1   ;;  %v339_v5 = vld [vmem:[%s4247_s1 + $0x8] sm:$0xff]  ;;  %v4259_v8 = vmov 0   ;;  %s2686_s22 = sshll.u32 %s2978_s8, 2 }
  0x19   : > { %2758 = vset.pattern.permute.xlu0 %v4257_v3  ;;  %2756 = vset.pattern.permute.xlu1 %v4257_v3  ;;  %v342_v4 = vld [vmem:[%s4247_s1 + $0x20] sm:$0xff]  ;;  %v344_v6 = vld [vmem:[%s4247_s1 + $0x30] sm:$0xff]  ;;  %v341_v7 = vld [vmem:[%s4247_s1 + $0x18] sm:$0xff]  ;;  %p330_p10 = scmp.lt.s32.totalorder %s2686_s22, 7  ;;  %s326_s29 = sand.u32 1, %s2890_s12  }
  0x1a   : > { %704 = vperm.xlu0 %2758, %v3008_v1   ;;  %696 = vperm.xlu1 %2756, %v3013_v2   ;;  %v346_v9 = vld [vmem:[%s4247_s1 + $0x40] sm:$0xff]  ;;  %v348_v10 = vld [vmem:[%s4247_s1 + $0x50] sm:$0xff]  ;;  %v343_v14 = vld [vmem:[%s4247_s1 + $0x28] sm:$0xff]  ;;  %s2685_s30 = sshll.u32 %s326_s29, 2 }
  0x1b   : > { %v1115_v11 = vld [vmem:[%s4248_s2] sm:$0xff]  ;;  %v3051_v13 = vld [vmem:[%s4247_s1 + $0x70] sm:$0xff]  ;;  %v345_v21 = vld [vmem:[%s4247_s1 + $0x38] sm:$0xff]  ;;  %s4335_s22 = smov (!%p330_p10, %s2686_s22), 7  ;;  %s328_s15 = scalar_lea.vmem [#allocation3], %s2685_s30 }
  0x1c   : > { %v3045_v12 = vld [vmem:[%s4247_s1 + $0x60] sm:$0xff]  ;;  %v3067_v16 = vld [vmem:[%s4247_s1 + $0x90] sm:$0xff]  ;;  %v347_v26 = vld [vmem:[%s4247_s1 + $0x48] sm:$0xff]  ;;  %s2687_s10 = sshll.u32 %s4335_s22, 1  ;;  %s2622_s17 = sshll.u32 %s328_s15, 4  ;;  %s4206_s17 = int_to_ptr.vmem [resolvable:$true] %s2622_s17 }
  0x1d   : > { %v3061_v15 = vld [vmem:[%s4247_s1 + $0x80] sm:$0xff]  ;;  %v1117_v18 = vld [vmem:[%s4248_s2 + $0x10] sm:$0xff]  ;;  %v1116_v27 = vld [vmem:[%s4248_s2 + $0x8] sm:$0xff]  ;;  %s333_s24 = scalar_lea.vmem %s4246_s0, %s2687_s10  ;;  %s2713_s10 = sshll.u32 %s2978_s8, 6 }
  0x1e   : > { %712 = vperm.xlu0 %2758, %v342_v4   ;;  %700 = vperm.xlu1 %2756, %v339_v5   ;;  %v3074_v17 = vld [vmem:[%s4247_s1 + $0xa0] sm:$0xff]  ;;  %v3084_v19 = vld [vmem:[%s4247_s1 + $0xb0] sm:$0xff]  ;;  %v1118_v29 = vld [vmem:[%s4248_s2 + $0x18] sm:$0xff]  ;;  %s2608_s22 = scalar_lea.sflag [#allocation4], %s326_s29  ;;  %s2836_s25 = scalar_lea.vmem %s4206_s17, 64 }
  0x1f   : > { %v3090_v20 = vld [vmem:[%s4247_s1 + $0xc0] sm:$0xff]  ;;  %v3099_v22 = vld [vmem:[%s4247_s1 + $0xd0] sm:$0xff]  ;;  %v1120_v30 = vld [vmem:[%s4248_s2 + $0x28] sm:$0xff]  ;;  %p2837_p11 = scmp.ne.s32.totalorder %s4206_s17, %s2836_s25  ;;  %s2903_s8 = smov [#allocation3]  }
  0x20   : > { %4279 = vst [vmem:[#allocation6_spill] sm:$0xff] %v3099_v22  ;;  %v366_v23 = vld [vmem:[%s4247_s1 + $0xe0] sm:$0xff]  ;;  %v368_v25 = vld [vmem:[%s4247_s1 + $0xf0] sm:$0xff]  ;;  %v349_v31 = vld [vmem:[%s4247_s1 + $0x58] sm:$0xff]  ;;  %s2840_s26 = sshll.u32 %s2903_s8, 4  ;;  %s2841_s26 = int_to_ptr.vmem [resolvable:$false] %s2840_s26 }
  0x21   : > { %v1119_v24 = vld [vmem:[%s4248_s2 + $0x20] sm:$0xff]  ;;  %v1121_v28 = vld [vmem:[%s4248_s2 + $0x30] sm:$0xff]  ;;  %v1122_v32 = vld [vmem:[%s4248_s2 + $0x38] sm:$0xff]  ;;  %p2838_p12 = pnand %p2837_p11, %p2995_p5  ;;  %s2842_s27 = scalar_lea.vmem %s2841_s26, 128 }
  0x22   : > { %720 = vperm.xlu0 %2758, %v344_v6   ;;  %2757 = vset.pattern.permute.xlu1 %v4259_v8  ;;  %v1124_v33 = vld [vmem:[%s4248_s2 + $0x48] sm:$0xff]  ;;  %v1123_v34 = vld [vmem:[%s4248_s2 + $0x40] sm:$0xff]  ;;  %v1126_v35 = vld [vmem:[%s4248_s2 + $0x58] sm:$0xff]  ;;  %p2843_p0 = scmp.lt.s32.totalorder %s4206_s17, %s2841_s26  ;;  %p2844_p1 = scmp.lt.s32.totalorder %s2842_s27, %s2836_s25 }
  0x23   : > { %387 = vperm.xlu1 %2757, %v341_v7   ;;  %v1128_v36 = vld [vmem:[%s4248_s2 + $0x68] sm:$0xff]  ;;  %v1130_v38 = vld [vmem:[%s4248_s2 + $0x78] sm:$0xff]  ;;  %v1125_v40 = vld [vmem:[%s4248_s2 + $0x50] sm:$0xff]  ;;  %p2839_p13 = pneg %p2838_p12 }
  0x24   : > { %v351_v37 = vld [vmem:[%s4247_s1 + $0x68] sm:$0xff]  ;;  %v1134_v41 = vld [vmem:[%s4248_s2 + $0x98] sm:$0xff]  ;;  %v1127_v47 = vld [vmem:[%s4248_s2 + $0x60] sm:$0xff]  ;;  %p2845_p2 = por %p2844_p1, %p2843_p0 }
  0x25   : > { %v1132_v39 = vld [vmem:[%s4248_s2 + $0x88] sm:$0xff]  ;;  %v353_v43 = vld [vmem:[%s4247_s1 + $0x78] sm:$0xff]  ;;  %v1643_v51 = vld [vmem:[%s4250_s4] sm:$0xff] }
  0x26   : > { %728 = vperm.xlu0 %2758, %v346_v9   ;;  %v1136_v42 = vld [vmem:[%s4248_s2 + $0xa8] sm:$0xff]  ;;  %v1138_v44 = vld [vmem:[%s4248_s2 + $0xb8] sm:$0xff]  ;;  %v1645_v55 = vld [vmem:[%s4250_s4 + $0x10] sm:$0xff]  ;;  %p2846_p3 = pnand %p2845_p2, %p2839_p13 }
  0x27   : > { %2759 = vset.pattern.permute.xlu1 %v4257_v3  ;;  %v1140_v45 = vld [vmem:[%s4248_s2 + $0xc8] sm:$0xff]  ;;  %v1142_v46 = vld [vmem:[%s4248_s2 + $0xd8] sm:$0xff]  ;;  %v1647_v58 = vld [vmem:[%s4250_s4 + $0x20] sm:$0xff] }
  0x28   : > { %708 = vperm.xlu1 %2759, %v341_v7   ;;  %v1144_v48 = vld [vmem:[%s4248_s2 + $0xe8] sm:$0xff]  ;;  %v1129_v61 = vld [vmem:[%s4248_s2 + $0x70] sm:$0xff] }
  0x29   : > { %v355_v54 = vld [vmem:[%s4247_s1 + $0x88] sm:$0xff]  ;;  %v1649_v62 = vld [vmem:[%s4250_s4 + $0x30] sm:$0xff] }
  0x2a   : > { %736 = vperm.xlu0 %2758, %v348_v10  }
  0x2c   : > { %2760 = vset.pattern.permute.xlu1 %v4259_v8 }
  0x2d   : > { %1149 = vperm.xlu1 %2760, %v1115_v11   ;;  %v1655_v11 = vld [vmem:[%s4250_s4 + $0x60] sm:$0xff] }
  0x2e   : > { %744 = vperm.xlu0 %2758, %v3045_v12  }
  0x31   : > { %392 = vperm.xlu1 %2760, %v342_v4  }
  0x32   : > { %752 = vperm.xlu0 %2758, %v3051_v13  }
  0x35   : > { %397 = vperm.xlu1 %2760, %v343_v14  }
  0x36   : > { %760 = vperm.xlu0 %2758, %v3061_v15  }
  0x39   : > { %2761 = vset.pattern.permute.xlu1 %v4257_v3 }
  0x3a   : > { %768 = vperm.xlu0 %2758, %v3067_v16   ;;  %716 = vperm.xlu1 %2761, %v343_v14   ;;  %v1657_v14 = vld [vmem:[%s4250_s4 + $0x70] sm:$0xff] }
  0x3e   : > { %776 = vperm.xlu0 %2758, %v3074_v17   ;;  %2762 = vset.pattern.permute.xlu1 %v4259_v8 }
  0x3f   : > { %1159 = vperm.xlu1 %2762, %v1117_v18   ;;  %v1131_v18 = vld [vmem:[%s4248_s2 + $0x80] sm:$0xff] }
  0x42   : > { %784 = vperm.xlu0 %2758, %v3084_v19  }
  0x43   : > { %402 = vperm.xlu1 %2762, %v344_v6   ;;  %v1653_v6 = vld [vmem:[%s4250_s4 + $0x50] sm:$0xff] }
  0x46   : > { %792 = vperm.xlu0 %2758, %v3090_v20  }
  0x47   : > { %407 = vperm.xlu1 %2762, %v345_v21  }
  0x4a   : > { %800 = vperm.xlu0 %2758, %v3099_v22  }
  0x4b   : > { %2763 = vset.pattern.permute.xlu1 %v4257_v3 }
  0x4c   : > { %724 = vperm.xlu1 %2763, %v345_v21  }
  0x4e   : > { %808 = vperm.xlu0 %2758, %v366_v23  }
  0x50   : > { %2764 = vset.pattern.permute.xlu1 %v4259_v8 }
  0x51   : > { %1169 = vperm.xlu1 %2764, %v1119_v24  }
  0x52   : > { %816 = vperm.xlu0 %2758, %v368_v25  }
  0x55   : > { %412 = vperm.xlu1 %2764, %v346_v9   ;;  %v4256_v9 = vlaneseq }
  0x56   : > { %2787 = vset.pattern.permute.xlu0 %v4259_v8 }
  0x57   : > { %372 = vperm.xlu0 %2787, %v3013_v2  }
  0x59   : > { %417 = vperm.xlu1 %2764, %v347_v26  }
  0x5b   : > { %377 = vperm.xlu0 %2787, %v339_v5   ;;  %v357_v5 = vld [vmem:[%s4247_s1 + $0x98] sm:$0xff] }
  0x5d   : > { %2765 = vset.pattern.permute.xlu1 %v4257_v3 }
  0x5e   : > { %732 = vperm.xlu1 %2765, %v347_v26   ;;  %v337_v26 = vld [vmem:[%s333_s24] sm:$0xff]  ;;  %s4204_s24 = scalar_lea.hbm %s4255_s9, %s2713_s10 }
  0x5f   : > { %382 = vperm.xlu0 %2787, %v3008_v1   ;;  %v1651_v1 = vld [vmem:[%s4250_s4 + $0x40] sm:$0xff] }
  0x62   : > { %2766 = vset.pattern.permute.xlu1 %v4259_v8 }
  0x63   : > { %1154 = vperm.xlu0 %2787, %v1116_v27   ;;  %1179 = vperm.xlu1 %2766, %v1121_v28   ;;  %v2149_v27 = vld [vmem:[%s4252_s6] sm:$0xff] }
  0x67   : > { %1164 = vperm.xlu0 %2787, %v1118_v29   ;;  %422 = vperm.xlu1 %2766, %v348_v10  }
  0x6b   : > { %1174 = vperm.xlu0 %2787, %v1120_v30   ;;  %427 = vperm.xlu1 %2766, %v349_v31  }
  0x6f   : > { %1184 = vperm.xlu0 %2787, %v1122_v32   ;;  %2767 = vset.pattern.permute.xlu1 %v4257_v3 }
  0x70   : > { %740 = vperm.xlu1 %2767, %v349_v31  }
  0x73   : > { %1194 = vperm.xlu0 %2787, %v1124_v33  }
  0x74   : > { %2768 = vset.pattern.permute.xlu1 %v4259_v8 }
  0x75   : > { %1189 = vperm.xlu1 %2768, %v1123_v34  }
  0x77   : > { %1204 = vperm.xlu0 %2787, %v1126_v35  }
  0x79   : > { %432 = vperm.xlu1 %2768, %v3045_v12  }
  0x7b   : > { %1214 = vperm.xlu0 %2787, %v1128_v36  }
  0x7d   : > { %437 = vperm.xlu1 %2768, %v351_v37  }
  0x7f   : > { %1224 = vperm.xlu0 %2787, %v1130_v38   ;;  %v2151_v38 = vld [vmem:[%s4252_s6 + $0x10] sm:$0xff] }
  0x81   : > { %2769 = vset.pattern.permute.xlu1 %v4257_v3 }
  0x82   : > { %748 = vperm.xlu1 %2769, %v351_v37  }
  0x83   : > { %1234 = vperm.xlu0 %2787, %v1132_v39  }
  0x86   : > { %2770 = vset.pattern.permute.xlu1 %v4259_v8 }
  0x87   : > { %1199 = vperm.xlu1 %2770, %v1125_v40   ;;  %1244 = vperm.xlu0 %2787, %v1134_v41  }
  0x8b   : > { %442 = vperm.xlu1 %2770, %v3051_v13   ;;  %1254 = vperm.xlu0 %2787, %v1136_v42   ;;  %v3261_v13 = vshrl.u32 %v4256_v9, 7 }
  0x8d   : > { %4284 = vst [vmem:[#allocation11_spill] sm:$0xff] %v3261_v13  ;;  %v829_v21 = vsub.s32 3, %v3261_v13  ;;  %v825_v23 = vsub.s32 1, %v3261_v13  ;;  %v833_v24 = vsub.s32 5, %v3261_v13  ;;  %v837_v25 = vsub.s32 7, %v3261_v13 }
  0x8e   : > { %v3286_v28 = vsub.s32 0, %v3261_v13  ;;  %v537_v30 = vsub.s32 2, %v3261_v13  ;;  %v541_v31 = vsub.s32 4, %v3261_v13  ;;  %v545_v32 = vsub.s32 6, %v3261_v13 }
  0x8f   : > { %447 = vperm.xlu1 %2770, %v353_v43   ;;  %1264 = vperm.xlu0 %2787, %v1138_v44   ;;  %v830_v34 = vrot.slane %v337_v26, %v829_v21  ;;  %v826_v35 = vrot.slane %v337_v26, %v825_v23  ;;  %v834_v36 = vrot.slane %v337_v26, %v833_v24 }
  0x90   : > { %4286 = vst [vmem:[#allocation13_spill] sm:$0xff] %v3286_v28  ;;  %v838_v37 = vrot.slane %v337_v26, %v837_v25  ;;  %v534_v39 = vrot.slane %v337_v26, %v3286_v28  ;;  %v538_v41 = vrot.slane %v337_v26, %v537_v30  ;;  %v542_v42 = vrot.slane %v337_v26, %v541_v31 }
  0x93   : > { %2771 = vset.pattern.permute.xlu1 %v4257_v3  ;;  %1274 = vperm.xlu0 %2787, %v1140_v45   ;;  %v359_v45 = vld [vmem:[%s4247_s1 + $0xa8] sm:$0xff] }
  0x94   : > { %756 = vperm.xlu1 %2771, %v353_v43   ;;  %v546_v43 = vrot.slane %v337_v26, %v545_v32 }
  0x97   : > { %1284 = vperm.xlu0 %2787, %v1142_v46   ;;  %v3307_v46 = vrot.slane %v830_v34, %v825_v23 }
  0x98   : > { %2772 = vset.pattern.permute.xlu1 %v4259_v8 }
  0x99   : > { %1209 = vperm.xlu1 %2772, %v1127_v47   ;;  %v3195_v49 = vpop.permute.xlu1 %696  ;;  %v3197_v50 = vpop.permute.xlu0 %704  ;;  %v3309_v47 = vrot.slane %v826_v35, %v825_v23 }
  0x9b   : > { %1294 = vperm.xlu0 %2787, %v1144_v48   ;;  %4289 = vst [vmem:[#allocation16_spill] sm:$0xff] %v3309_v47  ;;  %v3311_v48 = vrot.slane %v834_v36, %v825_v23 }
  0x9d   : > { %452 = vperm.xlu1 %2772, %v3061_v15   ;;  %v3203_v52 = vpop.permute.xlu1 %700  ;;  %v3205_v53 = vpop.permute.xlu0 %712  ;;  %v3369_v25 = vmul.f32 %v3311_v48, %v3195_v49 }
  0x9e   : > { %v875_v21 = vmul.f32 %v3309_v47, %v3205_v53  ;;  %v876_v26 = vmul.f32 %v3307_v46, %v3205_v53  ;;  %v3384_v32 = vmul.f32 %v3307_v46, %v3203_v52  ;;  %v3400_v35 = vmul.f32 %v3311_v48, %v3203_v52 }
  0x9f   : > { %1661 = vperm.xlu0 %2787, %v1643_v51   ;;  %v3313_v51 = vrot.slane %v838_v37, %v825_v23  ;;  %v2153_v23 = vld [vmem:[%s4252_s6 + $0x20] sm:$0xff] }
  0xa1   : > { %457 = vperm.xlu1 %2772, %v355_v54   ;;  %v3213_v56 = vpop.permute.xlu0 %720  ;;  %v3361_v24 = vmul.f32 %v3313_v51, %v3195_v49  ;;  %v878_v30 = vmul.f32 %v3313_v51, %v3205_v53  ;;  %v3392_v34 = vmul.f32 %v3313_v51, %v3203_v52 }
  0xa2   : > { %v3215_v57 = vpop.permute.xlu1 %387  ;;  %v884_v36 = vmul.f32 %v3307_v46, %v3213_v56  ;;  %v3406_v37 = vmul.f32 %v3311_v48, %v3213_v56 }
  0xa3   : > { %1671 = vperm.xlu0 %2787, %v1645_v55  }
  0xa5   : > { %2773 = vset.pattern.permute.xlu1 %v4257_v3  ;;  %v3221_v59 = vpop.permute.xlu0 %728 }
  0xa6   : > { %764 = vperm.xlu1 %2773, %v355_v54   ;;  %v3319_v54 = vrot.slane %v534_v39, %v3286_v28 }
  0xa7   : > { %v3223_v60 = vpop.permute.xlu1 %708  ;;  %1681 = vperm.xlu0 %2787, %v1647_v58   ;;  %v3325_v58 = vmul.f32 %v3309_v47, %v3197_v50 }
  0xa8   : > { %v871_v39 = vmul.f32 %v3309_v47, %v3223_v60 }
  0xa9   : > { %v3231_v63 = vpop.permute.xlu0 %736 }
  0xaa   : > { %4280 = vst [vmem:[#allocation7_spill] sm:$0xff] %v3231_v63  ;;  %2774 = vset.pattern.permute.xlu1 %v4259_v8 }
  0xab   : > { %1219 = vperm.xlu1 %2774, %v1129_v61   ;;  %1691 = vperm.xlu0 %2787, %v1649_v62   ;;  %v3328_v61 = vrot.slane %v538_v41, %v3286_v28  ;;  %v3331_v62 = vrot.slane %v542_v42, %v3286_v28  ;;  %v872_v42 = vmul.f32 %v3307_v46, %v3223_v60 }
  0xac   : > { %v3235_v0 = vpop.permute.xlu1 %1149 }
  0xad   : > { %v3240_v2 = vpop.permute.xlu0 %744  ;;  %v581_v9 = vmul.f32 %v3331_v62, %v3215_v57 }
  0xae   : > { %4281 = vst [vmem:[#allocation8_spill] sm:$0xff] %v3240_v2 }
  0xaf   : > { %462 = vperm.xlu1 %2774, %v3067_v16   ;;  %1701 = vperm.xlu0 %2787, %v1651_v1   ;;  %v3334_v1 = vrot.slane %v546_v43, %v3286_v28  ;;  %v873_v43 = vmul.f32 %v3311_v48, %v3223_v60  ;;  %v3442_v28 = vmul.f32 %v3309_v47, %v3221_v59 }
  0xb0   : > { %v3243_v4 = vpop.permute.xlu1 %392 }
  0xb1   : > { %v3251_v7 = vpop.permute.xlu0 %752  ;;  %v582_v13 = vmul.f32 %v3334_v1, %v3215_v57  ;;  %4293 = vst [vmem:[#allocation20_spill] sm:$0xff] %v3442_v28 }
  0xb2   : > { %4282 = vst [vmem:[#allocation9_spill] sm:$0xff] %v3251_v7  ;;  %v2155_v7 = vld [vmem:[%s4252_s6 + $0x30] sm:$0xff] }
  0xb3   : > { %467 = vperm.xlu1 %2774, %v357_v5   ;;  %1711 = vperm.xlu0 %2787, %v1653_v6   ;;  %v3340_v6 = vmul.f32 %v3307_v46, %v3197_v50 }
  0xb4   : > { %v3253_v10 = vpop.permute.xlu1 %397 }
  0xb5   : > { %v3258_v12 = vpop.permute.xlu0 %760 }
  0xb6   : > { %4283 = vst [vmem:[#allocation10_spill] sm:$0xff] %v3258_v12 }
  0xb7   : > { %2775 = vset.pattern.permute.xlu1 %v4257_v3  ;;  %1721 = vperm.xlu0 %2787, %v1655_v11   ;;  %v3344_v11 = vmul.f32 %v3311_v48, %v3197_v50 }
  0xb8   : > { %772 = vperm.xlu1 %2775, %v357_v5  }
  0xb9   : > { %v3270_v15 = vpop.permute.xlu1 %716  ;;  %v3272_v16 = vpop.permute.xlu0 %768 }
  0xba   : > { %4285 = vst [vmem:[#allocation12_spill] sm:$0xff] %v3272_v16  ;;  %v585_v16 = vmul.f32 %v3331_v62, %v3243_v4 }
  0xbb   : > { %1731 = vperm.xlu0 %2787, %v1657_v14   ;;  %v3348_v14 = vmul.f32 %v3313_v51, %v3197_v50  ;;  %v3365_v50 = vmul.f32 %v3309_v47, %v3195_v49 }
  0xbc   : > { %2776 = vset.pattern.permute.xlu1 %v4259_v8 }
  0xbd   : > { %1229 = vperm.xlu1 %2776, %v1131_v18   ;;  %v3288_v29 = vpop.permute.xlu0 %776  ;;  %v3352_v18 = vmul.f32 %v3307_v46, %v3195_v49  ;;  %v3388_v49 = vmul.f32 %v3309_v47, %v3213_v56 }
  0xbe   : > { %4287 = vst [vmem:[#allocation14_spill] sm:$0xff] %v3288_v29  ;;  %v3293_v33 = vpop.permute.xlu1 %1159 }
  0xbf   : > { %2159 = vperm.xlu0 %2787, %v2149_v27   ;;  %v3375_v27 = vmul.f32 %v3311_v48, %v3205_v53  ;;  %v3396_v53 = vmul.f32 %v3309_v47, %v3203_v52  ;;  %v579_v52 = vmul.f32 %v3319_v54, %v3215_v57 }
  0xc1   : > { %472 = vperm.xlu1 %2776, %v3074_v17   ;;  %v3300_v40 = vpop.permute.xlu0 %784  ;;  %v2399_v17 = vld [vmem:[%s4253_s7] sm:$0xff]  ;;  %v3459_v29 = vadd.f32 %v871_v39, %v579_v52  ;;  %v880_v39 = vmul.f32 %v3307_v46, %v3270_v15 }
  0xc2   : > { %4288 = vst [vmem:[#allocation15_spill] sm:$0xff] %v3300_v40  ;;  %v3302_v44 = vpop.permute.xlu1 %402  ;;  %v4296_v40 = vmov 0  }
  0xc3   : > { %2169 = vperm.xlu0 %2787, %v2151_v38   ;;  %v886_v38 = vmul.f32 %v3313_v51, %v3213_v56  ;;  %v1133_v56 = vld [vmem:[%s4248_s2 + $0x90] sm:$0xff] }
  0xc5   : > { %477 = vperm.xlu1 %2776, %v359_v45   ;;  %v3321_v55 = vpop.permute.xlu0 %792 }
  0xc6   : > { %4290 = vst [vmem:[#allocation17_spill] sm:$0xff] %v3321_v55  ;;  %v3336_v5 = vpop.permute.xlu1 %407  ;;  %v3450_v55 = vmul.f32 %v3311_v48, %v3221_v59 }
  0xc7   : > { %2409 = vperm.xlu0 %2787, %v2399_v17   ;;  %v2154_v17 = vld [vmem:[%s4252_s6 + $0x28] sm:$0xff] }
  0xc8   : > { %4295 = vst [vmem:[#allocation22_spill] sm:$0xff] %v3450_v55  ;;  %v881_v55 = vmul.f32 %v3311_v48, %v3270_v15 }
  0xc9   : > { %2777 = vset.pattern.permute.xlu1 %v4257_v3  ;;  %v3380_v31 = vpop.permute.xlu0 %800  ;;  %v584_v3 = vmul.f32 %v3328_v61, %v3243_v4 }
  0xca   : > { %4291 = vst [vmem:[#allocation18_spill] sm:$0xff] %v3380_v31  ;;  %780 = vperm.xlu1 %2777, %v359_v45   ;;  %v874_v45 = vmul.f32 %v3313_v51, %v3223_v60  ;;  %v586_v60 = vmul.f32 %v3334_v1, %v3243_v4  ;;  %v3446_v31 = vmul.f32 %v3307_v46, %v3221_v59 }
  0xcb   : > { %v3412_v41 = vpop.permute.xlu1 %724  ;;  %2179 = vperm.xlu0 %2787, %v2153_v23   ;;  %v580_v23 = vmul.f32 %v3328_v61, %v3215_v57  ;;  %v583_v57 = vmul.f32 %v3319_v54, %v3243_v4  ;;  %v1004_v4 = vadd.f32 %v876_v26, %v584_v3  ;;  %v589_v26 = vmul.f32 %v3331_v62, %v3253_v10 }
  0xcc   : > { %4294 = vst [vmem:[#allocation21_spill] sm:$0xff] %v3446_v31  ;;  %v3472_v63 = vadd.f32 %v874_v45, %v582_v13  ;;  %v594_v13 = vmul.f32 %v3334_v1, %v3302_v44  ;;  %v588_v45 = vmul.f32 %v3328_v61, %v3253_v10 }
  0xcd   : > { %v3436_v8 = vpop.permute.xlu0 %808  ;;  %v3468_v2 = vadd.f32 %v872_v42, %v580_v23  ;;  %v882_v42 = vmul.f32 %v3313_v51, %v3270_v15  ;;  %v1003_v3 = vadd.f32 %v875_v21, %v583_v57  ;;  %v593_v23 = vmul.f32 %v3331_v62, %v3302_v44  ;;  %v2156_v21 = vld [vmem:[%s4252_s6 + $0x38] sm:$0xff] }
  0xce   : > { %4292 = vst [vmem:[#allocation19_spill] sm:$0xff] %v3436_v8  ;;  %2778 = vset.pattern.permute.xlu1 %v4296_v40  ;;  %v3455_v8 = vmul.f32 %v3313_v51, %v3221_v59  ;;  %v3470_v59 = vadd.f32 %v873_v43, %v581_v9  ;;  %v592_v9 = vmul.f32 %v3328_v61, %v3302_v44 }
  0xcf   : > { %1239 = vperm.xlu1 %2778, %v1133_v56   ;;  %2184 = vperm.xlu0 %2787, %v2154_v17   ;;  %v879_v56 = vmul.f32 %v3309_v47, %v3270_v15  ;;  %v1006_v17 = vadd.f32 %v878_v30, %v586_v60  ;;  %v587_v43 = vmul.f32 %v3319_v54, %v3253_v10 }
  0xd0   : > { %4297 = vst [vmem:[#allocation23_spill] sm:$0xff] %v3455_v8  ;;  %v3463_v12 = vpop.permute.xlu1 %1169  ;;  %v590_v15 = vmul.f32 %v3334_v1, %v3253_v10  ;;  %v591_v30 = vmul.f32 %v3319_v54, %v3302_v44  ;;  %v3513_v57 = vadd.f32 %v880_v39, %v588_v45  ;;  %v3516_v22 = vadd.f32 %v881_v55, %v589_v26 }
  0xd1   : > { %v3478_v52 = vpop.permute.xlu0 %816  ;;  %v3511_v10 = vadd.f32 %v879_v56, %v587_v43  ;;  %v3520_v8 = vadd.f32 %v884_v36, %v592_v9  ;;  %v3522_v31 = vadd.f32 %v886_v38, %v594_v13  ;;  %v888_v56 = vmul.f32 %v3307_v46, %v3412_v41  ;;  %v2405_v43 = vld [vmem:[%s4253_s7 + $0x30] sm:$0xff] }
  0xd2   : > { %4298 = vst [vmem:[#allocation24_spill] sm:$0xff] %v3478_v52  ;;  %v1005_v52 = vadd.f32 %v3375_v27, %v585_v16  ;;  %v3518_v28 = vadd.f32 %v882_v42, %v590_v15  ;;  %v889_v39 = vmul.f32 %v3311_v48, %v3412_v41  ;;  %v890_v55 = vmul.f32 %v3313_v51, %v3412_v41 }
  0xd3   : > { %482 = vperm.xlu1 %2778, %v3084_v19   ;;  %2189 = vperm.xlu0 %2787, %v2155_v7   ;;  %v361_v19 = vld [vmem:[%s4247_s1 + $0xb8] sm:$0xff]  ;;  %v887_v7 = vmul.f32 %v3309_v47, %v3412_v41  ;;  %v595_v47 = vmul.f32 %v3319_v54, %v3336_v5  ;;  %v3537_v38 = vadd.f32 %v3388_v49, %v591_v30 }
  0xd4   : > { %v3501_v60 = vpop.permute.xlu1 %412  ;;  %v3540_v42 = vadd.f32 %v3406_v37, %v593_v23  ;;  %v596_v9 = vmul.f32 %v3328_v61, %v3336_v5  ;;  %v597_v13 = vmul.f32 %v3331_v62, %v3336_v5  ;;  %v598_v41 = vmul.f32 %v3334_v1, %v3336_v5 }
  0xd5   : > { %4299 = vst [vmem:[#allocation25_spill] sm:$0xff] %v3537_v38  ;;  %v3551_v45 = vadd.f32 %v887_v7, %v595_v47  ;;  %v3556_v15 = vadd.f32 %v3463_v12, %v1004_v4  ;;  %v3559_v30 = vadd.f32 %v3463_v12, %v1006_v17  ;;  %v4301_v23 = vmov 1  }
  0xd6   : > { %v373_v44 = vpop.permute.xlu0 %372  ;;  %4300 = vst [vmem:[#allocation26_spill] sm:$0xff] %v3540_v42  ;;  %v3565_v42 = vadd.f32 %v889_v39, %v597_v13  ;;  %v3568_v47 = vadd.f32 %v3463_v12, %v1003_v3  ;;  %v3571_v4 = vadd.f32 %v890_v55, %v598_v41  ;;  %v3574_v17 = vadd.f32 %v3463_v12, %v1005_v52  ;;  %v2531_v3 = vld [vmem:[#allocation2] sm:$0x1] }
  0xd7   : > { %v568_v16 = vmul.f32 %v3328_v61, %v373_v44  ;;  %487 = vperm.xlu1 %2778, %v361_v19   ;;  %v570_v27 = vmul.f32 %v3334_v1, %v373_v44  ;;  %2194 = vperm.xlu0 %2787, %v2156_v21   ;;  %v567_v49 = vmul.f32 %v3319_v54, %v373_v44 }
  0xd8   : > { %v3534_v36 = vpop.permute.xlu1 %417  ;;  %v569_v37 = vmul.f32 %v3331_v62, %v373_v44  ;;  %v3563_v21 = vadd.f32 %v888_v56, %v596_v9  ;;  %4302 = vst [vmem:[#allocation27_spill] sm:$0xff] %v3565_v42 }
  0xd9   : > { %v988_v5 = vadd.f32 %v3352_v18, %v568_v16  ;;  %v990_v7 = vadd.f32 %v3361_v24, %v570_v27  ;;  %v1135_v24 = vld [vmem:[%s4248_s2 + $0xa0] sm:$0xff]  ;;  %v987_v55 = vadd.f32 %v3365_v50, %v567_v49 }
  0xda   : > { %v378_v26 = vpop.permute.xlu0 %377  ;;  %v989_v12 = vadd.f32 %v3369_v25, %v569_v37 }
  0xdb   : > { %2779 = vset.pattern.permute.xlu1 %v4301_v23  ;;  %2439 = vperm.xlu0 %2787, %v2405_v43   ;;  %v571_v44 = vmul.f32 %v3319_v54, %v378_v26  ;;  %v572_v18 = vmul.f32 %v3328_v61, %v378_v26  ;;  %v573_v56 = vmul.f32 %v3331_v62, %v378_v26 }
  0xdc   : > { %788 = vperm.xlu1 %2779, %v361_v19   ;;  %v574_v39 = vmul.f32 %v3334_v1, %v378_v26  ;;  %v1308_v41 = vadd.f32 %v3235_v0, %v988_v5  ;;  %v1310_v50 = vadd.f32 %v3235_v0, %v990_v7  ;;  %v1307_v7 = vadd.f32 %v3235_v0, %v987_v55 }
  0xdd   : > { %v3580_v16 = vpop.permute.xlu1 %732  ;;  %v992_v49 = vadd.f32 %v3384_v32, %v572_v18  ;;  %v991_v5 = vadd.f32 %v3396_v53, %v571_v44  ;;  %v993_v43 = vadd.f32 %v3400_v35, %v573_v56 }
  0xde   : > { %v383_v19 = vpop.permute.xlu0 %382  ;;  %v994_v37 = vadd.f32 %v3392_v34, %v574_v39  ;;  %v1436_v35 = vmax.f32 %v1308_v41, 0.0  ;;  %v1438_v44 = vmax.f32 %v1310_v50, 0.0 }
  0xdf   : > { %v576_v9 = vmul.f32 %v3328_v61, %v383_v19  ;;  %v578_v13 = vmul.f32 %v3334_v1, %v383_v19  ;;  %v575_v26 = vmul.f32 %v3319_v54, %v383_v19  ;;  %v577_v38 = vmul.f32 %v3331_v62, %v383_v19  ;;  %2534 = vperm.xlu0 %2787, %v2531_v3  }
  0xe0   : > { %2780 = vset.pattern.permute.xlu1 %v4296_v40  ;;  %v1309_v3 = vadd.f32 %v3235_v0, %v989_v12  ;;  %v363_v0 = vld [vmem:[%s4247_s1 + $0xc8] sm:$0xff]  ;;  %v1435_v12 = vmax.f32 %v1307_v7, 0.0 }
  0xe1   : > { %1249 = vperm.xlu1 %2780, %v1135_v24   ;;  %v996_v27 = vadd.f32 %v3340_v6, %v576_v9  ;;  %v998_v19 = vadd.f32 %v3348_v14, %v578_v13  ;;  %v995_v34 = vadd.f32 %v3325_v58, %v575_v26  ;;  %v997_v53 = vadd.f32 %v3344_v11, %v577_v38 }
  0xe2   : > { %v1155_v52 = vpop.permute.xlu0 %1154  ;;  %v3604_v42 = vpop.permute.xlu1 %1179  ;;  %v600_v26 = vmul.f32 %v3328_v61, %v3501_v60 }
  0xe3   : > { %v1312_v24 = vadd.f32 %v1155_v52, %v992_v49  ;;  %v1314_v25 = vadd.f32 %v1155_v52, %v994_v37  ;;  %v1311_v32 = vadd.f32 %v1155_v52, %v991_v5  ;;  %v1313_v18 = vadd.f32 %v1155_v52, %v993_v43 }
  0xe4   : > { %v1437_v52 = vmax.f32 %v1309_v3, 0.0  ;;  %v1316_v58 = vadd.f32 %v3293_v33, %v996_v27  ;;  %v1318_v11 = vadd.f32 %v3293_v33, %v998_v19  ;;  %v3624_v43 = vmul.f32 %v3319_v54, %v3501_v60 }
  0xe5   : > { %492 = vperm.xlu1 %2780, %v3090_v20   ;;  %v1440_v6 = vmax.f32 %v1312_v24, 0.0  ;;  %v1442_v14 = vmax.f32 %v1314_v25, 0.0  ;;  %v1439_v56 = vmax.f32 %v1311_v32, 0.0  ;;  %v1441_v39 = vmax.f32 %v1313_v18, 0.0 }
  0xe6   : > { %v1165_v9 = vpop.permute.xlu0 %1164  ;;  %v3611_v55 = vpop.permute.xlu1 %422  ;;  %v1315_v50 = vadd.f32 %v3293_v33, %v995_v34  ;;  %v1317_v27 = vadd.f32 %v3293_v33, %v997_v53  ;;  %v1444_v32 = vmax.f32 %v1316_v58, 0.0  ;;  %v1446_v33 = vmax.f32 %v1318_v11, 0.0  ;;  %v4303_v11 = vld [vmem:[#allocation21_spill] sm:$0xff] }
  0xe7   : > { %v1319_v38 = vadd.f32 %v1165_v9, %v3459_v29  ;;  %v1320_v20 = vadd.f32 %v1165_v9, %v3468_v2  ;;  %v1321_v13 = vadd.f32 %v1165_v9, %v3470_v59  ;;  %v1322_v41 = vadd.f32 %v1165_v9, %v3472_v63 }
  0xe8   : > { %v1564_v25 = vpack.c.bf16 %v1440_v6, %v1436_v35  ;;  %v1566_v29 = vpack.c.bf16 %v1442_v14, %v1438_v44  ;;  %v1563_v49 = vpack.c.bf16 %v1439_v56, %v1435_v12  ;;  %v1565_v2 = vpack.c.bf16 %v1441_v39, %v1437_v52 }
  0xe9   : > { %497 = vperm.xlu1 %2780, %v363_v0   ;;  %v1448_v63 = vmax.f32 %v1320_v20, 0.0  ;;  %v1450_v5 = vmax.f32 %v1322_v41, 0.0  ;;  %v1447_v19 = vmax.f32 %v1319_v38, 0.0  ;;  %v1449_v7 = vmax.f32 %v1321_v13, 0.0  ;;  %v4305_v41 = vld [vmem:[#allocation23_spill] sm:$0xff] }
  0xea   : > { %v1175_v37 = vpop.permute.xlu0 %1174  ;;  %v3630_v59 = vpop.permute.xlu1 %427  ;;  %1819 = vmatprep.subr.bf16.mxu0 %v1564_v25  ;;  %1932 = vmatprep.subr.bf16.mxu1 %v1566_v29  ;;  %v602_v18 = vmul.f32 %v3334_v1, %v3501_v60  ;;  %v1443_v53 = vmax.f32 %v1315_v50, 0.0  ;;  %v1445_v35 = vmax.f32 %v1317_v27, 0.0  ;;  %v3639_v44 = vmul.f32 %v3331_v62, %v3501_v60 }
  0xeb   : > { %v1327_v3 = vadd.f32 %v1175_v37, %v3511_v10  ;;  %v1328_v24 = vadd.f32 %v1175_v37, %v3513_v57  ;;  %v1330_v34 = vadd.f32 %v1175_v37, %v3518_v28  ;;  %1820 = vmatpush1.bf16.msra.mxu0 %v1563_v49  ;;  %1933 = vmatpush1.bf16.msra.mxu1 %v1565_v2  ;;  %v4307_v29 = vmax.f32 %v3559_v30, 0.0 }
  0xec   : > { %v1568_v10 = vpack.c.bf16 %v1448_v63, %v1444_v32  ;;  %v1570_v6 = vpack.c.bf16 %v1450_v5, %v1446_v33  ;;  %v1329_v14 = vadd.f32 %v1175_v37, %v3516_v22  ;;  %v1567_v39 = vpack.c.bf16 %v1447_v19, %v1443_v53  ;;  %v1137_v37 = vld [vmem:[%s4248_s2 + $0xb0] sm:$0xff] }
  0xed   : > { %2781 = vset.pattern.permute.xlu1 %v4301_v23  ;;  %v1456_v57 = vmax.f32 %v1328_v24, 0.0  ;;  %v1569_v9 = vpack.c.bf16 %v1449_v7, %v1445_v35  ;;  %v1458_v28 = vmax.f32 %v1330_v34, 0.0  ;;  %v896_v12 = vmul.f32 %v3307_v46, %v3580_v16 }
  0xee   : > { %v1185_v56 = vpop.permute.xlu0 %1184  ;;  %796 = vperm.xlu1 %2781, %v363_v0   ;;  %1821 = vmatprep.subr.bf16.mxu0 %v1568_v10  ;;  %v1455_v58 = vmax.f32 %v1327_v3, 0.0  ;;  %v1020_v38 = vadd.f32 %v4303_v11, %v600_v26  ;;  %v604_v22 = vmul.f32 %v3328_v61, %v3534_v36  ;;  %v4304_v0 = vld [vmem:[#allocation16_spill] sm:$0xff]  ;;  %v1022_v50 = vadd.f32 %v4305_v41, %v602_v18  ;;  %v4309_v3 = vld [vmem:[#allocation27_spill] sm:$0xff] }
  0xef   : > { %1934 = vmatprep.subr.bf16.mxu1 %v1570_v6  ;;  %v1336_v60 = vadd.f32 %v1185_v56, %v3563_v21  ;;  %v3646_v52 = vpop.permute.xlu1 %740  ;;  %v895_v20 = vmul.f32 %v4304_v0, %v3580_v16  ;;  %v1338_v13 = vadd.f32 %v1185_v56, %v3571_v4  ;;  %1822 = vmatpush1.bf16.msra.mxu0 %v1567_v39  ;;  %v4306_v21 = vmax.f32 %v3556_v15, 0.0 }
  0xf0   : > { %v1335_v27 = vadd.f32 %v1185_v56, %v3551_v45  ;;  %1935 = vmatpush1.bf16.msra.mxu1 %v1569_v9  ;;  %v1574_v26 = vpack.c.bf16 %v1458_v28, %v4307_v29  ;;  %v4308_v49 = vmax.f32 %v3568_v47, 0.0  ;;  %v1457_v63 = vmax.f32 %v1329_v14, 0.0  ;;  %v4312_v28 = vld [vmem:[#allocation20_spill] sm:$0xff] }
  0xf1   : > { %v1572_v25 = vpack.c.bf16 %v1456_v57, %v4306_v21  ;;  %v1332_v45 = vadd.f32 %v3604_v42, %v3520_v8  ;;  %v1464_v5 = vmax.f32 %v1336_v60, 0.0  ;;  %v1334_v15 = vadd.f32 %v3604_v42, %v3522_v31  ;;  %v4311_v57 = vld [vmem:[#allocation25_spill] sm:$0xff] }
  0xf2   : > { %v1571_v2 = vpack.c.bf16 %v1455_v58, %v4308_v49  ;;  %v1195_v4 = vpop.permute.xlu0 %1194  ;;  %2782 = vset.pattern.permute.xlu1 %v4296_v40  ;;  %v897_v30 = vmul.f32 %v3311_v48, %v3580_v16  ;;  %v898_v47 = vmul.f32 %v3313_v51, %v3580_v16  ;;  %1936 = vmatprep.subr.bf16.mxu1 %v1574_v26  ;;  %v1466_v7 = vmax.f32 %v1338_v13, 0.0  ;;  %v4313_v58 = vld [vmem:[#allocation26_spill] sm:$0xff]  ;;  %v365_v49 = vld [vmem:[%s4247_s1 + $0xd8] sm:$0xff] }
  0xf3   : > { %1823 = vmatprep.subr.bf16.mxu0 %v1572_v25  ;;  %v1024_v19 = vadd.f32 %v896_v12, %v604_v22  ;;  %v1337_v24 = vadd.f32 %v1185_v56, %v4309_v3  ;;  %v4310_v32 = vmax.f32 %v3574_v17, 0.0  ;;  %1259 = vperm.xlu1 %2782, %v1137_v37   ;;  %v1460_v18 = vmax.f32 %v1332_v45, 0.0  ;;  %v4316_v37 = vld [vmem:[#allocation7_spill] sm:$0xff] }
  0xf4   : > { %1824 = vmatpush1.bf16.msra.mxu0 %v1571_v2  ;;  %v1190_v33 = vpop.permute.xlu1 %1189  ;;  %v1462_v31 = vmax.f32 %v1334_v15, 0.0  ;;  %v603_v34 = vmul.f32 %v3319_v54, %v3534_v36  ;;  %v605_v16 = vmul.f32 %v3331_v62, %v3534_v36  ;;  %v606_v53 = vmul.f32 %v3334_v1, %v3534_v36 }
  0xf5   : > { %v1573_v8 = vpack.c.bf16 %v1457_v63, %v4310_v32  ;;  %v1344_v35 = vadd.f32 %v1195_v4, %v1024_v19  ;;  %v1576_v10 = vpack.c.bf16 %v1464_v5, %v1460_v18  ;;  %v1331_v17 = vadd.f32 %v3604_v42, %v4311_v57 }
  0xf6   : > { %v1578_v6 = vpack.c.bf16 %v1466_v7, %v1462_v31  ;;  %v1463_v14 = vmax.f32 %v1335_v27, 0.0  ;;  %v1023_v56 = vadd.f32 %v895_v20, %v603_v34  ;;  %v1025_v39 = vadd.f32 %v897_v30, %v605_v16  ;;  %v4314_v27 = vld [vmem:[#allocation6_spill] sm:$0xff] }
  0xf7   : > { %1937 = vmatpush1.bf16.msra.mxu1 %v1573_v8  ;;  %v1026_v9 = vadd.f32 %v898_v47, %v606_v53  ;;  %v1019_v12 = vadd.f32 %v4312_v28, %v3624_v43  ;;  %1825 = vmatprep.subr.bf16.mxu0 %v1576_v10  ;;  %v1459_v60 = vmax.f32 %v1331_v17, 0.0  ;;  %v1333_v36 = vadd.f32 %v3604_v42, %v4313_v58  ;;  %v4315_v20 = vld [vmem:[#allocation22_spill] sm:$0xff]  ;;  %v1205_v28 = vpop.permute.xlu0 %1204 }
  0xf8   : > { %1938 = vmatprep.subr.bf16.mxu1 %v1578_v6  ;;  %v1465_v11 = vmax.f32 %v1337_v24, 0.0  ;;  %v3689_v22 = vpop.permute.xlu1 %432  ;;  %v1340_v13 = vadd.f32 %v1190_v33, %v1020_v38  ;;  %v1343_v41 = vadd.f32 %v1195_v4, %v1023_v56  ;;  %v1345_v21 = vadd.f32 %v1195_v4, %v1025_v39  ;;  %502 = vperm.xlu1 %2782, %v4314_v27  }
  0xf9   : > { %v1346_v25 = vadd.f32 %v1195_v4, %v1026_v9  ;;  %v1021_v29 = vadd.f32 %v4315_v20, %v3639_v44  ;;  %v1575_v26 = vpack.c.bf16 %v1463_v14, %v1459_v60  ;;  %v1461_v43 = vmax.f32 %v1333_v36, 0.0 }
  0xfa   : > { %v1468_v2 = vmax.f32 %v1340_v13, 0.0  ;;  %v1472_v42 = vmax.f32 %v1344_v35, 0.0  ;;  %v899_v63 = vmul.f32 %v4304_v0, %v4316_v37  ;;  %v900_v38 = vmul.f32 %v3307_v46, %v4316_v37 }
  0xfb   : > { %v1342_v4 = vadd.f32 %v1190_v33, %v1022_v50  ;;  %v1339_v45 = vadd.f32 %v1190_v33, %v1019_v12  ;;  %v901_v5 = vmul.f32 %v3311_v48, %v4316_v37  ;;  %1826 = vmatpush1.bf16.msra.mxu0 %v1575_v26  ;;  %v1577_v44 = vpack.c.bf16 %v1465_v11, %v1461_v43  ;;  %v1139_v11 = vld [vmem:[%s4248_s2 + $0xc0] sm:$0xff] }
  0xfc   : > { %v1580_v15 = vpack.c.bf16 %v1472_v42, %v1468_v2  ;;  %v3703_v30 = vpop.permute.xlu1 %437  ;;  %v1341_v47 = vadd.f32 %v1190_v33, %v1021_v29  ;;  %v902_v19 = vmul.f32 %v3313_v51, %v4316_v37  ;;  %v607_v7 = vmul.f32 %v3319_v54, %v3611_v55  ;;  %507 = vperm.xlu1 %2782, %v365_v49  }
  0xfd   : > { %v1470_v3 = vmax.f32 %v1342_v4, 0.0  ;;  %v1474_v24 = vmax.f32 %v1346_v25, 0.0  ;;  %1939 = vmatpush1.bf16.msra.mxu1 %v1577_v44  ;;  %v1467_v50 = vmax.f32 %v1339_v45, 0.0  ;;  %v1471_v32 = vmax.f32 %v1343_v41, 0.0 }
  0xfe   : > { %1827 = vmatprep.subr.bf16.mxu0 %v1580_v15  ;;  %v1469_v8 = vmax.f32 %v1341_v47, 0.0  ;;  %v1473_v18 = vmax.f32 %v1345_v21, 0.0  ;;  %v608_v31 = vmul.f32 %v3328_v61, %v3611_v55  ;;  %v903_v33 = vmul.f32 %v4304_v0, %v3646_v52 }
  0xff   : > { %v904_v34 = vmul.f32 %v3307_v46, %v3646_v52  ;;  %v1582_v16 = vpack.c.bf16 %v1474_v24, %v1470_v3  ;;  %v905_v53 = vmul.f32 %v3311_v48, %v3646_v52  ;;  %v906_v35 = vmul.f32 %v3313_v51, %v3646_v52 }
 0x100   : > { %v1579_v10 = vpack.c.bf16 %v1471_v32, %v1467_v50  ;;  %v1581_v6 = vpack.c.bf16 %v1473_v18, %v1469_v8  ;;  %v609_v57 = vmul.f32 %v3331_v62, %v3611_v55  ;;  %v610_v17 = vmul.f32 %v3334_v1, %v3611_v55  ;;  %2783 = vset.pattern.permute.xlu1 %v4301_v23  ;;  %v367_v50 = vld [vmem:[%s4247_s1 + $0xe8] sm:$0xff] }
 0x101   : > { %v612_v14 = vmul.f32 %v3328_v61, %v3630_v59  ;;  %1940 = vmatprep.subr.bf16.mxu1 %v1582_v16  ;;  %v749_v56 = vpop.permute.xlu1 %748  ;;  %v611_v39 = vmul.f32 %v3319_v54, %v3630_v59  ;;  %v613_v52 = vmul.f32 %v3331_v62, %v3630_v59  ;;  %v614_v9 = vmul.f32 %v3334_v1, %v3630_v59 }
 0x102   : > { %1828 = vmatpush1.bf16.msra.mxu0 %v1579_v10  ;;  %1941 = vmatpush1.bf16.msra.mxu1 %v1581_v6  ;;  %v1028_v13 = vadd.f32 %v900_v38, %v608_v31  ;;  %v1030_v41 = vadd.f32 %v902_v19, %v610_v17  ;;  %v1027_v21 = vadd.f32 %v899_v63, %v607_v7 }
 0x103   : > { %v1032_v55 = vadd.f32 %v904_v34, %v612_v14  ;;  %804 = vperm.xlu1 %2783, %v365_v49   ;;  %v1031_v12 = vadd.f32 %v903_v33, %v611_v39  ;;  %v1033_v60 = vadd.f32 %v905_v53, %v613_v52  ;;  %v1034_v58 = vadd.f32 %v906_v35, %v614_v9  ;;  %v4317_v34 = vld [vmem:[#allocation8_spill] sm:$0xff] }
 0x104   : > { %v1029_v29 = vadd.f32 %v901_v5, %v609_v57  ;;  %v2834_v5 = vld [vmem:[%s4247_s1 + $0xe0] sm:$0xff]  ;;  %v911_v8 = vmul.f32 %v4304_v0, %v749_v56  ;;  %v912_v18 = vmul.f32 %v3307_v46, %v749_v56  ;;  %v913_v31 = vmul.f32 %v3311_v48, %v749_v56 }
 0x105   : > { %v1352_v36 = vadd.f32 %v1205_v28, %v1032_v55  ;;  %v1351_v25 = vadd.f32 %v1205_v28, %v1031_v12  ;;  %v1353_v27 = vadd.f32 %v1205_v28, %v1033_v60  ;;  %v1354_v20 = vadd.f32 %v1205_v28, %v1034_v58 }
 0x106   : > { %v1200_v59 = vpop.permute.xlu1 %1199  ;;  %v914_v33 = vmul.f32 %v3313_v51, %v749_v56  ;;  %v907_v16 = vmul.f32 %v4304_v0, %v4317_v34  ;;  %v908_v53 = vmul.f32 %v3307_v46, %v4317_v34  ;;  %v909_v35 = vmul.f32 %v3311_v48, %v4317_v34 }
 0x107   : > { %2784 = vset.pattern.permute.xlu1 %v4296_v40  ;;  %v1348_v26 = vadd.f32 %v1200_v59, %v1028_v13  ;;  %v1350_v43 = vadd.f32 %v1200_v59, %v1030_v41  ;;  %v1347_v49 = vadd.f32 %v1200_v59, %v1027_v21  ;;  %v1349_v2 = vadd.f32 %v1200_v59, %v1029_v29 }
 0x108   : > { %1269 = vperm.xlu1 %2784, %v1139_v11   ;;  %v1480_v37 = vmax.f32 %v1352_v36, 0.0  ;;  %v1482_v38 = vmax.f32 %v1354_v20, 0.0  ;;  %v1479_v63 = vmax.f32 %v1351_v25, 0.0  ;;  %v1481_v47 = vmax.f32 %v1353_v27, 0.0  ;;  %v1141_v36 = vld [vmem:[%s4248_s2 + $0xd0] sm:$0xff] }
 0x109   : > { %v1476_v42 = vmax.f32 %v1348_v26, 0.0  ;;  %v1478_v4 = vmax.f32 %v1350_v43, 0.0  ;;  %v1475_v45 = vmax.f32 %v1347_v49, 0.0  ;;  %v1477_v15 = vmax.f32 %v1349_v2, 0.0 }
 0x10a   : > { %v3736_v44 = vpop.permute.xlu1 %442  ;;  %v910_v10 = vmul.f32 %v3313_v51, %v4317_v34  ;;  %v619_v6 = vmul.f32 %v3319_v54, %v3703_v30  ;;  %v620_v57 = vmul.f32 %v3328_v61, %v3703_v30  ;;  %v621_v17 = vmul.f32 %v3331_v62, %v3703_v30 }
 0x10b   : > { %v1584_v19 = vpack.c.bf16 %v1480_v37, %v1476_v42  ;;  %v1586_v7 = vpack.c.bf16 %v1482_v38, %v1478_v4  ;;  %v1583_v3 = vpack.c.bf16 %v1479_v63, %v1475_v45  ;;  %v1585_v24 = vpack.c.bf16 %v1481_v47, %v1477_v15 }
 0x10c   : > { %512 = vperm.xlu1 %2784, %v2834_v5   ;;  %v622_v14 = vmul.f32 %v3334_v1, %v3703_v30  ;;  %v615_v56 = vmul.f32 %v3319_v54, %v3689_v22  ;;  %v616_v39 = vmul.f32 %v3328_v61, %v3689_v22  ;;  %v617_v52 = vmul.f32 %v3331_v62, %v3689_v22  ;;  %v1215_v30 = vpop.permute.xlu0 %1214  ;;  %v2835_v5 = vld [vmem:[%s4247_s1 + $0xf0] sm:$0xff] }
 0x10d   : > { %1829 = vmatprep.subr.bf16.mxu0 %v1584_v19  ;;  %1942 = vmatprep.subr.bf16.mxu1 %v1586_v7  ;;  %v618_v9 = vmul.f32 %v3334_v1, %v3689_v22  ;;  %v1039_v55 = vadd.f32 %v911_v8, %v619_v6  ;;  %v1040_v12 = vadd.f32 %v912_v18, %v620_v57 }
 0x10e   : > { %v3744_v32 = vpop.permute.xlu1 %447  ;;  %1830 = vmatpush1.bf16.msra.mxu0 %v1583_v3  ;;  %1943 = vmatpush1.bf16.msra.mxu1 %v1585_v24  ;;  %v1041_v60 = vadd.f32 %v913_v31, %v621_v17  ;;  %v1042_v58 = vadd.f32 %v914_v33, %v622_v14  ;;  %v1036_v11 = vadd.f32 %v908_v53, %v616_v39 }
 0x10f   : > { %v1038_v13 = vadd.f32 %v910_v10, %v618_v9  ;;  %v1035_v41 = vadd.f32 %v907_v16, %v615_v56  ;;  %v1037_v21 = vadd.f32 %v909_v35, %v617_v52  ;;  %v1359_v25 = vadd.f32 %v1215_v30, %v1039_v55  ;;  %v4318_v16 = vld [vmem:[#allocation9_spill] sm:$0xff] }
 0x110   : > { %517 = vperm.xlu1 %2784, %v367_v50   ;;  %v1360_v27 = vadd.f32 %v1215_v30, %v1040_v12  ;;  %v1361_v22 = vadd.f32 %v1215_v30, %v1041_v60  ;;  %v1362_v20 = vadd.f32 %v1215_v30, %v1042_v58  ;;  %v915_v53 = vmul.f32 %v4304_v0, %v4318_v16 }
 0x111   : > { %v1487_v15 = vmax.f32 %v1359_v25, 0.0  ;;  %v916_v35 = vmul.f32 %v3307_v46, %v4318_v16  ;;  %v917_v10 = vmul.f32 %v3311_v48, %v4318_v16  ;;  %v918_v6 = vmul.f32 %v3313_v51, %v4318_v16  ;;  %v4319_v16 = vld [vmem:[#allocation10_spill] sm:$0xff] }
 0x112   : > { %v1488_v38 = vmax.f32 %v1360_v27, 0.0  ;;  %v1490_v63 = vmax.f32 %v1362_v20, 0.0  ;;  %v1489_v47 = vmax.f32 %v1361_v22, 0.0  ;;  %v627_v57 = vmul.f32 %v3319_v54, %v3744_v32 }
 0x113   : > { %v757_v28 = vpop.permute.xlu1 %756  ;;  %v628_v17 = vmul.f32 %v3328_v61, %v3744_v32  ;;  %v629_v14 = vmul.f32 %v3331_v62, %v3744_v32  ;;  %v630_v56 = vmul.f32 %v3334_v1, %v3744_v32  ;;  %v623_v39 = vmul.f32 %v3319_v54, %v3736_v44  ;;  %v1225_v32 = vpop.permute.xlu0 %1224 }
 0x114   : > { %2785 = vset.pattern.permute.xlu1 %v4301_v23  ;;  %v919_v18 = vmul.f32 %v4304_v0, %v757_v28  ;;  %v920_v31 = vmul.f32 %v3307_v46, %v757_v28  ;;  %v921_v33 = vmul.f32 %v3311_v48, %v757_v28  ;;  %v922_v34 = vmul.f32 %v3313_v51, %v757_v28 }
 0x115   : > { %812 = vperm.xlu1 %2785, %v367_v50   ;;  %v369_v50 = vld [vmem:[%s4247_s1 + $0xf8] sm:$0xff]  ;;  %v624_v52 = vmul.f32 %v3328_v61, %v3736_v44  ;;  %v625_v9 = vmul.f32 %v3331_v62, %v3736_v44  ;;  %v626_v28 = vmul.f32 %v3334_v1, %v3736_v44 }
 0x116   : > { %v1048_v12 = vadd.f32 %v920_v31, %v628_v17  ;;  %v1050_v60 = vadd.f32 %v922_v34, %v630_v56  ;;  %v1047_v58 = vadd.f32 %v919_v18, %v627_v57  ;;  %v1049_v30 = vadd.f32 %v921_v33, %v629_v14  ;;  %v1644_v57 = vld [vmem:[%s4250_s4 + $0x8] sm:$0xff] }
 0x118   : > { %v1210_v59 = vpop.permute.xlu1 %1209  ;;  %v1368_v27 = vadd.f32 %v1225_v32, %v1048_v12  ;;  %v1370_v44 = vadd.f32 %v1225_v32, %v1050_v60  ;;  %v1367_v22 = vadd.f32 %v1225_v32, %v1047_v58  ;;  %v1369_v20 = vadd.f32 %v1225_v32, %v1049_v30 }
 0x119   : > { %2786 = vset.pattern.permute.xlu1 %v4296_v40  ;;  %v1356_v29 = vadd.f32 %v1210_v59, %v1036_v11  ;;  %v1358_v26 = vadd.f32 %v1210_v59, %v1038_v13  ;;  %v1355_v43 = vadd.f32 %v1210_v59, %v1035_v41  ;;  %v1357_v49 = vadd.f32 %v1210_v59, %v1037_v21 }
 0x11a   : > { %1279 = vperm.xlu1 %2786, %v1141_v36   ;;  %v1143_v36 = vld [vmem:[%s4248_s2 + $0xe0] sm:$0xff]  ;;  %v1043_v11 = vadd.f32 %v915_v53, %v623_v39  ;;  %v1044_v13 = vadd.f32 %v916_v35, %v624_v52  ;;  %v1045_v41 = vadd.f32 %v917_v10, %v625_v9  ;;  %v1046_v21 = vadd.f32 %v918_v6, %v626_v28 }
 0x11b   : > { %v1484_v2 = vmax.f32 %v1356_v29, 0.0  ;;  %v1486_v42 = vmax.f32 %v1358_v26, 0.0  ;;  %v1483_v37 = vmax.f32 %v1355_v43, 0.0  ;;  %v1485_v4 = vmax.f32 %v1357_v49, 0.0  ;;  %v1145_v43 = vld [vmem:[%s4248_s2 + $0xf0] sm:$0xff] }
 0x11c   : > { %v3779_v45 = vpop.permute.xlu1 %452  ;;  %v923_v53 = vmul.f32 %v4304_v0, %v4319_v16  ;;  %v924_v35 = vmul.f32 %v3307_v46, %v4319_v16  ;;  %v925_v10 = vmul.f32 %v3311_v48, %v4319_v16  ;;  %v926_v6 = vmul.f32 %v3313_v51, %v4319_v16 }
 0x11d   : > { %v1588_v19 = vpack.c.bf16 %v1488_v38, %v1484_v2  ;;  %v1590_v7 = vpack.c.bf16 %v1490_v63, %v1486_v42  ;;  %v1587_v3 = vpack.c.bf16 %v1487_v15, %v1483_v37  ;;  %v1589_v24 = vpack.c.bf16 %v1489_v47, %v1485_v4 }
 0x11e   : > { %522 = vperm.xlu1 %2786, %v2835_v5   ;;  %v1496_v38 = vmax.f32 %v1368_v27, 0.0  ;;  %v1498_v63 = vmax.f32 %v1370_v44, 0.0  ;;  %v1495_v15 = vmax.f32 %v1367_v22, 0.0  ;;  %v1497_v47 = vmax.f32 %v1369_v20, 0.0 }
 0x11f   : > { %1831 = vmatprep.subr.bf16.mxu0 %v1588_v19  ;;  %1944 = vmatprep.subr.bf16.mxu1 %v1590_v7  ;;  %v631_v52 = vmul.f32 %v3319_v54, %v3779_v45  ;;  %v632_v9 = vmul.f32 %v3328_v61, %v3779_v45  ;;  %v633_v28 = vmul.f32 %v3331_v62, %v3779_v45 }
 0x120   : > { %v3787_v8 = vpop.permute.xlu1 %457  ;;  %1832 = vmatpush1.bf16.msra.mxu0 %v1587_v3  ;;  %1945 = vmatpush1.bf16.msra.mxu1 %v1589_v24  ;;  %v1146_v24 = vld [vmem:[%s4248_s2 + $0xf8] sm:$0xff] }
 0x121   : > { %v635_v17 = vmul.f32 %v3319_v54, %v3787_v8  ;;  %v636_v14 = vmul.f32 %v3328_v61, %v3787_v8  ;;  %v637_v56 = vmul.f32 %v3331_v62, %v3787_v8  ;;  %v638_v39 = vmul.f32 %v3334_v1, %v3787_v8  ;;  %v1646_v8 = vld [vmem:[%s4250_s4 + $0x18] sm:$0xff] }
 0x122   : > { %527 = vperm.xlu1 %2786, %v369_v50  }
 0x125   : > { %v765_v55 = vpop.permute.xlu1 %764 }
 0x126   : > { %2788 = vset.pattern.permute.xlu1 %v4301_v23  ;;  %v927_v18 = vmul.f32 %v4304_v0, %v765_v55  ;;  %v928_v31 = vmul.f32 %v3307_v46, %v765_v55  ;;  %v929_v33 = vmul.f32 %v3311_v48, %v765_v55  ;;  %v930_v34 = vmul.f32 %v3313_v51, %v765_v55 }
 0x127   : > { %820 = vperm.xlu1 %2788, %v369_v50   ;;  %v634_v55 = vmul.f32 %v3334_v1, %v3779_v45 }
 0x128   : > { %v1055_v60 = vadd.f32 %v927_v18, %v635_v17  ;;  %v1056_v58 = vadd.f32 %v928_v31, %v636_v14  ;;  %v1057_v30 = vadd.f32 %v929_v33, %v637_v56  ;;  %v1058_v32 = vadd.f32 %v930_v34, %v638_v39  ;;  %v1652_v34 = vld [vmem:[%s4250_s4 + $0x48] sm:$0xff] }
 0x12a   : > { %v1220_v25 = vpop.permute.xlu1 %1219 }
 0x12b   : > { %2789 = vset.pattern.permute.xlu1 %v4296_v40  ;;  %v1363_v23 = vadd.f32 %v1220_v25, %v1043_v11  ;;  %v1364_v59 = vadd.f32 %v1220_v25, %v1044_v13  ;;  %v1365_v29 = vadd.f32 %v1220_v25, %v1045_v41  ;;  %v1366_v26 = vadd.f32 %v1220_v25, %v1046_v21  ;;  %v2792_v25 = vld [vmem:[%s4249_s3 + $0x4] ss:$8 sps:$4 sm:$0xff]  }
 0x12c   : > { %1289 = vperm.xlu1 %2789, %v1143_v36   ;;  %v1235_v36 = vpop.permute.xlu0 %1234  ;;  %v1051_v11 = vadd.f32 %v923_v53, %v631_v52  ;;  %v1052_v13 = vadd.f32 %v924_v35, %v632_v9  ;;  %v1053_v41 = vadd.f32 %v925_v10, %v633_v28  ;;  %v1054_v21 = vadd.f32 %v926_v6, %v634_v55  ;;  %v1654_v9 = vld [vmem:[%s4250_s4 + $0x58] sm:$0xff] }
 0x12d   : > { %v1492_v49 = vmax.f32 %v1364_v59, 0.0  ;;  %v1494_v2 = vmax.f32 %v1366_v26, 0.0  ;;  %v1491_v42 = vmax.f32 %v1363_v23, 0.0  ;;  %v1493_v37 = vmax.f32 %v1365_v29, 0.0  ;;  %1851 = vmatprep.mubr.bf16.mxu0 %v2792_v25  ;;  %1964 = vmatprep.mubr.bf16.mxu1 %v2792_v25 }
 0x12e   : > { %v3825_v4 = vpop.permute.xlu1 %462  ;;  %v1376_v27 = vadd.f32 %v1235_v36, %v1056_v58  ;;  %v1378_v44 = vadd.f32 %v1235_v36, %v1058_v32  ;;  %v1375_v22 = vadd.f32 %v1235_v36, %v1055_v60  ;;  %v1377_v20 = vadd.f32 %v1235_v36, %v1057_v30  ;;  %v4320_v58 = vld [vmem:[#allocation12_spill] sm:$0xff] }
 0x12f   : > { %v1592_v5 = vpack.c.bf16 %v1496_v38, %v1492_v49  ;;  %v1594_v19 = vpack.c.bf16 %v1498_v63, %v1494_v2  ;;  %v1591_v7 = vpack.c.bf16 %v1495_v15, %v1491_v42  ;;  %v1593_v3 = vpack.c.bf16 %v1497_v47, %v1493_v37 }
 0x130   : > { %1299 = vperm.xlu1 %2789, %v1145_v43   ;;  %v1648_v43 = vld [vmem:[%s4250_s4 + $0x28] sm:$0xff]  ;;  %v1504_v63 = vmax.f32 %v1376_v27, 0.0  ;;  %v1506_v15 = vmax.f32 %v1378_v44, 0.0  ;;  %v1503_v47 = vmax.f32 %v1375_v22, 0.0  ;;  %v639_v14 = vmul.f32 %v3319_v54, %v3825_v4  ;;  %v1245_v36 = vpop.permute.xlu0 %1244 }
 0x131   : > { %1833 = vmatprep.subr.bf16.mxu0 %v1592_v5  ;;  %1946 = vmatprep.subr.bf16.mxu1 %v1594_v19  ;;  %v1505_v5 = vmax.f32 %v1377_v20, 0.0  ;;  %v1650_v19 = vld [vmem:[%s4250_s4 + $0x38] sm:$0xff]  ;;  %v640_v56 = vmul.f32 %v3328_v61, %v3825_v4  ;;  %v641_v39 = vmul.f32 %v3331_v62, %v3825_v4  ;;  %v642_v52 = vmul.f32 %v3334_v1, %v3825_v4 }
 0x132   : > { %v3830_v50 = vpop.permute.xlu1 %467  ;;  %1834 = vmatpush1.bf16.msra.mxu0 %v1591_v7  ;;  %1947 = vmatpush1.bf16.msra.mxu1 %v1593_v3  ;;  %v931_v30 = vmul.f32 %v4304_v0, %v4320_v58  ;;  %v932_v32 = vmul.f32 %v3307_v46, %v4320_v58  ;;  %v934_v4 = vmul.f32 %v3313_v51, %v4320_v58 }
 0x133   : > { %v643_v10 = vmul.f32 %v3319_v54, %v3830_v50  ;;  %v644_v6 = vmul.f32 %v3328_v61, %v3830_v50  ;;  %v646_v17 = vmul.f32 %v3334_v1, %v3830_v50 }
 0x134   : > { %1304 = vperm.xlu1 %2789, %v1146_v24   ;;  %v1062_v25 = vadd.f32 %v934_v4, %v642_v52 }
 0x137   : > { %v773_v12 = vpop.permute.xlu1 %772 }
 0x138   : > { %1666 = vperm.xlu1 %2789, %v1644_v57   ;;  %v935_v33 = vmul.f32 %v4304_v0, %v773_v12  ;;  %v936_v16 = vmul.f32 %v3307_v46, %v773_v12  ;;  %v937_v53 = vmul.f32 %v3311_v48, %v773_v12  ;;  %v938_v35 = vmul.f32 %v3313_v51, %v773_v12 }
 0x139   : > { %v645_v57 = vmul.f32 %v3331_v62, %v3830_v50 }
 0x13a   : > { %v1063_v55 = vadd.f32 %v935_v33, %v643_v10  ;;  %v1064_v50 = vadd.f32 %v936_v16, %v644_v6  ;;  %v1066_v60 = vadd.f32 %v938_v35, %v646_v17  ;;  %v2150_v33 = vld [vmem:[%s4252_s6 + $0x8] sm:$0xff]  ;;  %v2152_v6 = vld [vmem:[%s4252_s6 + $0x18] sm:$0xff] }
 0x13b   : > { %v1065_v12 = vadd.f32 %v937_v53, %v645_v57 }
 0x13c   : > { %1676 = vperm.xlu1 %2789, %v1646_v8   ;;  %v1230_v45 = vpop.permute.xlu1 %1229  ;;  %v933_v8 = vmul.f32 %v3311_v48, %v4320_v58  ;;  %v1384_v27 = vadd.f32 %v1245_v36, %v1064_v50  ;;  %v1386_v44 = vadd.f32 %v1245_v36, %v1066_v60  ;;  %v1383_v22 = vadd.f32 %v1245_v36, %v1063_v55 }
 0x13d   : > { %v1371_v23 = vadd.f32 %v1230_v45, %v1051_v11  ;;  %v1372_v59 = vadd.f32 %v1230_v45, %v1052_v13  ;;  %v1373_v29 = vadd.f32 %v1230_v45, %v1053_v41  ;;  %v1374_v26 = vadd.f32 %v1230_v45, %v1054_v21  ;;  %v1656_v11 = vld [vmem:[%s4250_s4 + $0x68] sm:$0xff] }
 0x13e   : > { %v1059_v13 = vadd.f32 %v931_v30, %v639_v14  ;;  %v1060_v41 = vadd.f32 %v932_v32, %v640_v56  ;;  %v1061_v21 = vadd.f32 %v933_v8, %v641_v39  ;;  %v1385_v20 = vadd.f32 %v1245_v36, %v1065_v12  ;;  %v4321_v30 = vld [vmem:[#allocation14_spill] sm:$0xff]  ;;  %v1255_v36 = vpop.permute.xlu0 %1254 }
 0x13f   : > { %v1500_v49 = vmax.f32 %v1372_v59, 0.0  ;;  %v1502_v2 = vmax.f32 %v1374_v26, 0.0  ;;  %v1499_v42 = vmax.f32 %v1371_v23, 0.0  ;;  %v1501_v37 = vmax.f32 %v1373_v29, 0.0 }
 0x140   : > { %1686 = vperm.xlu1 %2789, %v1648_v43   ;;  %v3872_v38 = vpop.permute.xlu1 %472  ;;  %v1658_v43 = vld [vmem:[%s4250_s4 + $0x78] sm:$0xff]  ;;  %v940_v32 = vmul.f32 %v3307_v46, %v4321_v30  ;;  %v941_v8 = vmul.f32 %v3311_v48, %v4321_v30  ;;  %v942_v4 = vmul.f32 %v3313_v51, %v4321_v30 }
 0x141   : > { %v1596_v7 = vpack.c.bf16 %v1504_v63, %v1500_v49  ;;  %v1598_v3 = vpack.c.bf16 %v1506_v15, %v1502_v2  ;;  %v1595_v24 = vpack.c.bf16 %v1503_v47, %v1499_v42  ;;  %v1597_v18 = vpack.c.bf16 %v1505_v5, %v1501_v37 }
 0x142   : > { %v1512_v15 = vmax.f32 %v1384_v27, 0.0  ;;  %v1514_v47 = vmax.f32 %v1386_v44, 0.0  ;;  %v1511_v5 = vmax.f32 %v1383_v22, 0.0  ;;  %v647_v39 = vmul.f32 %v3319_v54, %v3872_v38 }
 0x143   : > { %1835 = vmatprep.subr.bf16.mxu0 %v1596_v7  ;;  %1948 = vmatprep.subr.bf16.mxu1 %v1598_v3  ;;  %v648_v52 = vmul.f32 %v3328_v61, %v3872_v38 }
 0x144   : > { %1696 = vperm.xlu1 %2789, %v1650_v19   ;;  %v3877_v31 = vpop.permute.xlu1 %477  ;;  %1836 = vmatpush1.bf16.msra.mxu0 %v1595_v24  ;;  %v1513_v19 = vmax.f32 %v1385_v20, 0.0 }
 0x145   : > { %1949 = vmatpush1.bf16.msra.mxu1 %v1597_v18  ;;  %v651_v57 = vmul.f32 %v3319_v54, %v3877_v31  ;;  %v652_v17 = vmul.f32 %v3328_v61, %v3877_v31  ;;  %v653_v14 = vmul.f32 %v3331_v62, %v3877_v31  ;;  %v654_v56 = vmul.f32 %v3334_v1, %v3877_v31 }
 0x146   : > { %v939_v31 = vmul.f32 %v4304_v0, %v4321_v30 }
 0x148   : > { %1706 = vperm.xlu1 %2789, %v1652_v34  }
 0x149   : > { %v781_v28 = vpop.permute.xlu1 %780 }
 0x14a   : > { %v943_v16 = vmul.f32 %v4304_v0, %v781_v28  ;;  %v944_v53 = vmul.f32 %v3307_v46, %v781_v28  ;;  %v945_v35 = vmul.f32 %v3311_v48, %v781_v28  ;;  %v946_v10 = vmul.f32 %v3313_v51, %v781_v28 }
 0x14b   : > { %v650_v28 = vmul.f32 %v3334_v1, %v3872_v38 }
 0x14c   : > { %1716 = vperm.xlu1 %2789, %v1654_v9   ;;  %v649_v9 = vmul.f32 %v3331_v62, %v3872_v38  ;;  %v1071_v50 = vadd.f32 %v943_v16, %v651_v57  ;;  %v1072_v12 = vadd.f32 %v944_v53, %v652_v17  ;;  %v1073_v60 = vadd.f32 %v945_v35, %v653_v14  ;;  %v2400_v38 = vld [vmem:[%s4253_s7 + $0x8] sm:$0xff]  ;;  %v2403_v57 = vld [vmem:[%s4253_s7 + $0x20] sm:$0xff] }
 0x14d   : > { %v1074_v58 = vadd.f32 %v946_v10, %v654_v56 }
 0x14e   : > { %v1240_v45 = vpop.permute.xlu1 %1239  ;;  %v1391_v44 = vadd.f32 %v1255_v36, %v1071_v50  ;;  %v1393_v22 = vadd.f32 %v1255_v36, %v1073_v60  ;;  %v2404_v50 = vld [vmem:[%s4253_s7 + $0x28] sm:$0xff] }
 0x14f   : > { %v1379_v23 = vadd.f32 %v1240_v45, %v1059_v13  ;;  %v1380_v59 = vadd.f32 %v1240_v45, %v1060_v41  ;;  %v1381_v29 = vadd.f32 %v1240_v45, %v1061_v21  ;;  %v1382_v26 = vadd.f32 %v1240_v45, %v1062_v25 }
 0x150   : > { %1726 = vperm.xlu1 %2789, %v1656_v11   ;;  %v1067_v11 = vadd.f32 %v939_v31, %v647_v39  ;;  %v1068_v13 = vadd.f32 %v940_v32, %v648_v52  ;;  %v1069_v41 = vadd.f32 %v941_v8, %v649_v9  ;;  %v1070_v21 = vadd.f32 %v942_v4, %v650_v28  ;;  %v4322_v31 = vld [vmem:[#allocation15_spill] sm:$0xff] }
 0x151   : > { %v1508_v49 = vmax.f32 %v1380_v59, 0.0  ;;  %v1510_v2 = vmax.f32 %v1382_v26, 0.0  ;;  %v1507_v42 = vmax.f32 %v1379_v23, 0.0  ;;  %v1509_v37 = vmax.f32 %v1381_v29, 0.0  ;;  %v2401_v26 = vld [vmem:[%s4253_s7 + $0x10] sm:$0xff] }
 0x152   : > { %v3919_v63 = vpop.permute.xlu1 %482  ;;  %v1392_v45 = vadd.f32 %v1255_v36, %v1072_v12  ;;  %v1394_v27 = vadd.f32 %v1255_v36, %v1074_v58  ;;  %v947_v32 = vmul.f32 %v4304_v0, %v4322_v31  ;;  %v948_v8 = vmul.f32 %v3307_v46, %v4322_v31  ;;  %v1265_v36 = vpop.permute.xlu0 %1264 }
 0x153   : > { %v1600_v7 = vpack.c.bf16 %v1512_v15, %v1508_v49  ;;  %v1602_v3 = vpack.c.bf16 %v1514_v47, %v1510_v2  ;;  %v1599_v24 = vpack.c.bf16 %v1511_v5, %v1507_v42  ;;  %v1601_v18 = vpack.c.bf16 %v1513_v19, %v1509_v37 }
 0x154   : > { %1736 = vperm.xlu1 %2789, %v1658_v43   ;;  %v1520_v15 = vmax.f32 %v1392_v45, 0.0  ;;  %v1522_v47 = vmax.f32 %v1394_v27, 0.0  ;;  %v1519_v5 = vmax.f32 %v1391_v44, 0.0  ;;  %v1521_v19 = vmax.f32 %v1393_v22, 0.0 }
 0x155   : > { %1837 = vmatprep.subr.bf16.mxu0 %v1600_v7  ;;  %1950 = vmatprep.subr.bf16.mxu1 %v1602_v3  ;;  %v2402_v7 = vld [vmem:[%s4253_s7 + $0x18] sm:$0xff]  ;;  %v655_v60 = vmul.f32 %v3319_v54, %v3919_v63  ;;  %v656_v58 = vmul.f32 %v3328_v61, %v3919_v63  ;;  %v657_v30 = vmul.f32 %v3331_v62, %v3919_v63 }
 0x156   : > { %v3924_v34 = vpop.permute.xlu1 %487  ;;  %1838 = vmatpush1.bf16.msra.mxu0 %v1599_v24  ;;  %1951 = vmatpush1.bf16.msra.mxu1 %v1601_v18  ;;  %v949_v4 = vmul.f32 %v3311_v48, %v4322_v31 }
 0x157   : > { %v659_v17 = vmul.f32 %v3319_v54, %v3924_v34  ;;  %v660_v14 = vmul.f32 %v3328_v61, %v3924_v34  ;;  %v661_v56 = vmul.f32 %v3331_v62, %v3924_v34  ;;  %v662_v39 = vmul.f32 %v3334_v1, %v3924_v34 }
 0x158   : > { %2164 = vperm.xlu1 %2789, %v2150_v33   ;;  %v658_v34 = vmul.f32 %v3334_v1, %v3919_v63  ;;  %v1076_v45 = vadd.f32 %v948_v8, %v656_v58  ;;  %v1077_v27 = vadd.f32 %v949_v4, %v657_v30  ;;  %v4323_v30 = vld [vmem:[#allocation17_spill] sm:$0xff]  ;;  %v1275_v8 = vpop.permute.xlu0 %1274 }
 0x15b   : > { %v789_v55 = vpop.permute.xlu1 %788 }
 0x15c   : > { %2174 = vperm.xlu1 %2789, %v2152_v6   ;;  %v951_v53 = vmul.f32 %v4304_v0, %v789_v55  ;;  %v952_v35 = vmul.f32 %v3307_v46, %v789_v55  ;;  %v953_v10 = vmul.f32 %v3311_v48, %v789_v55  ;;  %v954_v6 = vmul.f32 %v3313_v51, %v789_v55 }
 0x15e   : > { %v1079_v52 = vadd.f32 %v951_v53, %v659_v17  ;;  %v1080_v9 = vadd.f32 %v952_v35, %v660_v14  ;;  %v1081_v28 = vadd.f32 %v953_v10, %v661_v56  ;;  %v1082_v55 = vadd.f32 %v954_v6, %v662_v39 }
 0x160   : > { %2414 = vperm.xlu1 %2789, %v2400_v38   ;;  %v1250_v25 = vpop.permute.xlu1 %1249  ;;  %v950_v38 = vmul.f32 %v3313_v51, %v4322_v31  ;;  %v1402_v63 = vadd.f32 %v1265_v36, %v1082_v55  ;;  %v957_v31 = vmul.f32 %v3311_v48, %v4323_v30 }
 0x161   : > { %v1387_v20 = vadd.f32 %v1250_v25, %v1067_v11  ;;  %v1388_v23 = vadd.f32 %v1250_v25, %v1068_v13  ;;  %v1389_v59 = vadd.f32 %v1250_v25, %v1069_v41  ;;  %v1390_v29 = vadd.f32 %v1250_v25, %v1070_v21  ;;  %v2406_v11 = vld [vmem:[%s4253_s7 + $0x38] sm:$0xff] }
 0x162   : > { %v1400_v13 = vadd.f32 %v1265_v36, %v1080_v9  ;;  %v1399_v41 = vadd.f32 %v1265_v36, %v1079_v52  ;;  %v1401_v21 = vadd.f32 %v1265_v36, %v1081_v28  ;;  %v1075_v25 = vadd.f32 %v947_v32, %v655_v60 }
 0x163   : > { %v1516_v43 = vmax.f32 %v1388_v23, 0.0  ;;  %v1518_v49 = vmax.f32 %v1390_v29, 0.0  ;;  %v1515_v2 = vmax.f32 %v1387_v20, 0.0  ;;  %v1517_v42 = vmax.f32 %v1389_v59, 0.0 }
 0x164   : > { %2419 = vperm.xlu1 %2789, %v2401_v26   ;;  %v3963_v37 = vpop.permute.xlu1 %492  ;;  %v1078_v44 = vadd.f32 %v950_v38, %v658_v34  ;;  %v1528_v26 = vmax.f32 %v1400_v13, 0.0  ;;  %v956_v34 = vmul.f32 %v3307_v46, %v4323_v30  ;;  %v958_v32 = vmul.f32 %v3313_v51, %v4323_v30 }
 0x165   : > { %v1604_v3 = vpack.c.bf16 %v1520_v15, %v1516_v43  ;;  %v1606_v24 = vpack.c.bf16 %v1522_v47, %v1518_v49  ;;  %v1603_v18 = vpack.c.bf16 %v1519_v5, %v1515_v2  ;;  %v1605_v33 = vpack.c.bf16 %v1521_v19, %v1517_v42 }
 0x166   : > { %v1530_v43 = vmax.f32 %v1402_v63, 0.0  ;;  %v1527_v49 = vmax.f32 %v1399_v41, 0.0  ;;  %v1529_v2 = vmax.f32 %v1401_v21, 0.0  ;;  %v663_v39 = vmul.f32 %v3319_v54, %v3963_v37 }
 0x167   : > { %1839 = vmatprep.subr.bf16.mxu0 %v1604_v3  ;;  %1952 = vmatprep.subr.bf16.mxu1 %v1606_v24  ;;  %v664_v52 = vmul.f32 %v3328_v61, %v3963_v37  ;;  %v665_v9 = vmul.f32 %v3331_v62, %v3963_v37  ;;  %v666_v28 = vmul.f32 %v3334_v1, %v3963_v37 }
 0x168   : > { %2424 = vperm.xlu1 %2789, %v2402_v7   ;;  %v3968_v16 = vpop.permute.xlu1 %497  ;;  %1840 = vmatpush1.bf16.msra.mxu0 %v1603_v18 }
 0x169   : > { %1953 = vmatpush1.bf16.msra.mxu1 %v1605_v33  ;;  %v668_v17 = vmul.f32 %v3328_v61, %v3968_v16  ;;  %v669_v14 = vmul.f32 %v3331_v62, %v3968_v16  ;;  %v670_v56 = vmul.f32 %v3334_v1, %v3968_v16  ;;  %v1084_v37 = vadd.f32 %v956_v34, %v664_v52 }
 0x16a   : > { %v1085_v38 = vadd.f32 %v957_v31, %v665_v9  ;;  %v1086_v36 = vadd.f32 %v958_v32, %v666_v28 }
 0x16c   : > { %2429 = vperm.xlu1 %2789, %v2403_v57   ;;  %v667_v57 = vmul.f32 %v3319_v54, %v3968_v16  ;;  %v955_v16 = vmul.f32 %v4304_v0, %v4323_v30 }
 0x16d   : > { %v797_v12 = vpop.permute.xlu1 %796 }
 0x16e   : > { %v959_v53 = vmul.f32 %v4304_v0, %v797_v12  ;;  %v960_v35 = vmul.f32 %v3307_v46, %v797_v12  ;;  %v961_v10 = vmul.f32 %v3311_v48, %v797_v12  ;;  %v962_v6 = vmul.f32 %v3313_v51, %v797_v12 }
 0x16f   : > { %v1083_v4 = vadd.f32 %v955_v16, %v663_v39  ;;  %v1285_v16 = vpop.permute.xlu0 %1284 }
 0x170   : > { %2434 = vperm.xlu1 %2789, %v2404_v50   ;;  %v1087_v50 = vadd.f32 %v959_v53, %v667_v57  ;;  %v1088_v12 = vadd.f32 %v960_v35, %v668_v17  ;;  %v1089_v60 = vadd.f32 %v961_v10, %v669_v14  ;;  %v1090_v58 = vadd.f32 %v962_v6, %v670_v56 }
 0x172   : > { %v1260_v22 = vpop.permute.xlu1 %1259  ;;  %v1408_v13 = vadd.f32 %v1275_v8, %v1088_v12  ;;  %v1410_v63 = vadd.f32 %v1275_v8, %v1090_v58  ;;  %v1407_v41 = vadd.f32 %v1275_v8, %v1087_v50  ;;  %v1409_v21 = vadd.f32 %v1275_v8, %v1089_v60  ;;  %v4324_v12 = vld [vmem:[#allocation18_spill] sm:$0xff] }
 0x173   : > { %v1395_v20 = vadd.f32 %v1260_v22, %v1075_v25  ;;  %v1396_v23 = vadd.f32 %v1260_v22, %v1076_v45  ;;  %v1397_v59 = vadd.f32 %v1260_v22, %v1077_v27  ;;  %v1398_v29 = vadd.f32 %v1260_v22, %v1078_v44 }
 0x174   : > { %2444 = vperm.xlu1 %2789, %v2406_v11   ;;  %v964_v60 = vmul.f32 %v3307_v46, %v4324_v12  ;;  %v965_v58 = vmul.f32 %v3311_v48, %v4324_v12  ;;  %v966_v30 = vmul.f32 %v3313_v51, %v4324_v12 }
 0x175   : > { %v1524_v42 = vmax.f32 %v1396_v23, 0.0  ;;  %v1526_v15 = vmax.f32 %v1398_v29, 0.0  ;;  %v1523_v47 = vmax.f32 %v1395_v20, 0.0  ;;  %v1525_v5 = vmax.f32 %v1397_v59, 0.0 }
 0x177   : > { %v4007_v19 = vpop.permute.xlu1 %502  ;;  %v1608_v7 = vpack.c.bf16 %v1528_v26, %v1524_v42  ;;  %v1610_v3 = vpack.c.bf16 %v1530_v43, %v1526_v15  ;;  %v1607_v24 = vpack.c.bf16 %v1527_v49, %v1523_v47  ;;  %v1609_v18 = vpack.c.bf16 %v1529_v2, %v1525_v5 }
 0x178   : > { %v1536_v26 = vmax.f32 %v1408_v13, 0.0  ;;  %v1538_v43 = vmax.f32 %v1410_v63, 0.0  ;;  %v1535_v49 = vmax.f32 %v1407_v41, 0.0  ;;  %v1537_v2 = vmax.f32 %v1409_v21, 0.0 }
 0x179   : > { %1841 = vmatprep.subr.bf16.mxu0 %v1608_v7  ;;  %1954 = vmatprep.subr.bf16.mxu1 %v1610_v3  ;;  %v671_v17 = vmul.f32 %v3319_v54, %v4007_v19  ;;  %v672_v14 = vmul.f32 %v3328_v61, %v4007_v19  ;;  %v673_v56 = vmul.f32 %v3331_v62, %v4007_v19 }
 0x17a   : > { %1842 = vmatpush1.bf16.msra.mxu0 %v1607_v24  ;;  %1955 = vmatpush1.bf16.msra.mxu1 %v1609_v18  ;;  %v674_v39 = vmul.f32 %v3334_v1, %v4007_v19 }
 0x17b   : > { %v508_v33 = vpop.permute.xlu1 %507  ;;  %v1092_v19 = vadd.f32 %v964_v60, %v672_v14  ;;  %v1093_v31 = vadd.f32 %v965_v58, %v673_v56  ;;  %v4325_v14 = vld [vmem:[#allocation19_spill] sm:$0xff] }
 0x17c   : > { %v675_v35 = vmul.f32 %v3319_v54, %v508_v33  ;;  %v676_v10 = vmul.f32 %v3328_v61, %v508_v33  ;;  %v677_v6 = vmul.f32 %v3331_v62, %v508_v33  ;;  %v678_v57 = vmul.f32 %v3334_v1, %v508_v33 }
 0x17d   : > { %v963_v33 = vmul.f32 %v4304_v0, %v4324_v12  ;;  %v1094_v32 = vadd.f32 %v966_v30, %v674_v39  ;;  %v971_v56 = vmul.f32 %v4304_v0, %v4325_v14  ;;  %v972_v39 = vmul.f32 %v3307_v46, %v4325_v14 }
 0x17f   : > { %v1091_v34 = vadd.f32 %v963_v33, %v671_v17 }
 0x182   : > { %v805_v55 = vpop.permute.xlu1 %804 }
 0x183   : > { %v967_v3 = vmul.f32 %v4304_v0, %v805_v55  ;;  %v968_v24 = vmul.f32 %v3307_v46, %v805_v55  ;;  %v969_v18 = vmul.f32 %v3311_v48, %v805_v55  ;;  %v970_v53 = vmul.f32 %v3313_v51, %v805_v55 }
 0x185   : > { %v1095_v9 = vadd.f32 %v967_v3, %v675_v35  ;;  %v1096_v28 = vadd.f32 %v968_v24, %v676_v10  ;;  %v1097_v55 = vadd.f32 %v969_v18, %v677_v6  ;;  %v1098_v50 = vadd.f32 %v970_v53, %v678_v57 }
 0x187   : > { %v1270_v11 = vpop.permute.xlu1 %1269 }
 0x188   : > { %v1403_v25 = vadd.f32 %v1270_v11, %v1083_v4  ;;  %v1404_v45 = vadd.f32 %v1270_v11, %v1084_v37  ;;  %v1405_v27 = vadd.f32 %v1270_v11, %v1085_v38  ;;  %v1406_v44 = vadd.f32 %v1270_v11, %v1086_v36 }
 0x189   : > { %v1416_v4 = vadd.f32 %v1285_v16, %v1096_v28  ;;  %v1418_v37 = vadd.f32 %v1285_v16, %v1098_v50  ;;  %v1415_v38 = vadd.f32 %v1285_v16, %v1095_v9  ;;  %v1417_v36 = vadd.f32 %v1285_v16, %v1097_v55  ;;  %v1295_v9 = vpop.permute.xlu0 %1294 }
 0x18a   : > { %v1532_v22 = vmax.f32 %v1404_v45, 0.0  ;;  %v1534_v20 = vmax.f32 %v1406_v44, 0.0  ;;  %v1531_v23 = vmax.f32 %v1403_v25, 0.0  ;;  %v1533_v59 = vmax.f32 %v1405_v27, 0.0 }
 0x18b   : > { %v4037_v29 = vpop.permute.xlu1 %512 }
 0x18c   : > { %v1612_v42 = vpack.c.bf16 %v1536_v26, %v1532_v22  ;;  %v1614_v15 = vpack.c.bf16 %v1538_v43, %v1534_v20  ;;  %v1611_v47 = vpack.c.bf16 %v1535_v49, %v1531_v23  ;;  %v1613_v5 = vpack.c.bf16 %v1537_v2, %v1533_v59 }
 0x18d   : > { %v1544_v22 = vmax.f32 %v1416_v4, 0.0  ;;  %v1546_v20 = vmax.f32 %v1418_v37, 0.0  ;;  %v1543_v23 = vmax.f32 %v1415_v38, 0.0  ;;  %v1545_v59 = vmax.f32 %v1417_v36, 0.0 }
 0x18e   : > { %1843 = vmatprep.subr.bf16.mxu0 %v1612_v42  ;;  %1956 = vmatprep.subr.bf16.mxu1 %v1614_v15  ;;  %v679_v28 = vmul.f32 %v3319_v54, %v4037_v29  ;;  %v680_v55 = vmul.f32 %v3328_v61, %v4037_v29  ;;  %v681_v50 = vmul.f32 %v3331_v62, %v4037_v29 }
 0x18f   : > { %v518_v7 = vpop.permute.xlu1 %517  ;;  %1844 = vmatpush1.bf16.msra.mxu0 %v1611_v47  ;;  %1957 = vmatpush1.bf16.msra.mxu1 %v1613_v5  ;;  %v682_v12 = vmul.f32 %v3334_v1, %v4037_v29 }
 0x190   : > { %v683_v3 = vmul.f32 %v3319_v54, %v518_v7  ;;  %v684_v24 = vmul.f32 %v3328_v61, %v518_v7  ;;  %v685_v18 = vmul.f32 %v3331_v62, %v518_v7  ;;  %v686_v53 = vmul.f32 %v3334_v1, %v518_v7 }
 0x191   : > { %v974_v7 = vmul.f32 %v3313_v51, %v4325_v14  ;;  %v1099_v36 = vadd.f32 %v971_v56, %v679_v28 }
 0x194   : > { %v813_v52 = vpop.permute.xlu1 %812 }
 0x195   : > { %v975_v26 = vmul.f32 %v4304_v0, %v813_v52  ;;  %v976_v43 = vmul.f32 %v3307_v46, %v813_v52  ;;  %v977_v49 = vmul.f32 %v3311_v48, %v813_v52  ;;  %v978_v2 = vmul.f32 %v3313_v51, %v813_v52 }
 0x196   : > { %v973_v52 = vmul.f32 %v3311_v48, %v4325_v14 }
 0x197   : > { %v1103_v10 = vadd.f32 %v975_v26, %v683_v3  ;;  %v1104_v6 = vadd.f32 %v976_v43, %v684_v24  ;;  %v1105_v57 = vadd.f32 %v977_v49, %v685_v18  ;;  %v1106_v17 = vadd.f32 %v978_v2, %v686_v53 }
 0x199   : > { %v1280_v8 = vpop.permute.xlu1 %1279  ;;  %v1424_v60 = vadd.f32 %v1295_v9, %v1104_v6  ;;  %v1426_v58 = vadd.f32 %v1295_v9, %v1106_v17  ;;  %v1423_v30 = vadd.f32 %v1295_v9, %v1103_v10  ;;  %v1425_v16 = vadd.f32 %v1295_v9, %v1105_v57 }
 0x19a   : > { %v1411_v11 = vadd.f32 %v1280_v8, %v1091_v34  ;;  %v1412_v13 = vadd.f32 %v1280_v8, %v1092_v19  ;;  %v1413_v63 = vadd.f32 %v1280_v8, %v1093_v31  ;;  %v1414_v41 = vadd.f32 %v1280_v8, %v1094_v32  ;;  %v4326_v8 = vld [vmem:[#allocation24_spill] sm:$0xff] }
 0x19b   : > { %v979_v4 = vmul.f32 %v4304_v0, %v4326_v8  ;;  %v980_v37 = vmul.f32 %v3307_v46, %v4326_v8  ;;  %v981_v29 = vmul.f32 %v3311_v48, %v4326_v8  ;;  %v982_v38 = vmul.f32 %v3313_v51, %v4326_v8 }
 0x19c   : > { %v1540_v21 = vmax.f32 %v1412_v13, 0.0  ;;  %v1542_v25 = vmax.f32 %v1414_v41, 0.0  ;;  %v1539_v45 = vmax.f32 %v1411_v11, 0.0  ;;  %v1541_v27 = vmax.f32 %v1413_v63, 0.0 }
 0x19d   : > { %v523_v44 = vpop.permute.xlu1 %522  ;;  %v1100_v11 = vadd.f32 %v972_v39, %v680_v55  ;;  %v1101_v13 = vadd.f32 %v973_v52, %v681_v50  ;;  %v1102_v63 = vadd.f32 %v974_v7, %v682_v12  ;;  %v1552_v41 = vmax.f32 %v1424_v60, 0.0 }
 0x19e   : > { %v1616_v42 = vpack.c.bf16 %v1544_v22, %v1540_v21  ;;  %v1618_v15 = vpack.c.bf16 %v1546_v20, %v1542_v25  ;;  %v1615_v47 = vpack.c.bf16 %v1543_v23, %v1539_v45  ;;  %v1617_v5 = vpack.c.bf16 %v1545_v59, %v1541_v27 }
 0x19f   : > { %v687_v34 = vmul.f32 %v3319_v54, %v523_v44  ;;  %v688_v19 = vmul.f32 %v3328_v61, %v523_v44  ;;  %v689_v31 = vmul.f32 %v3331_v62, %v523_v44  ;;  %v690_v32 = vmul.f32 %v3334_v1, %v523_v44 }
 0x1a0   : > { %1845 = vmatprep.subr.bf16.mxu0 %v1616_v42  ;;  %1958 = vmatprep.subr.bf16.mxu1 %v1618_v15  ;;  %v1554_v21 = vmax.f32 %v1426_v58, 0.0  ;;  %v1551_v25 = vmax.f32 %v1423_v30, 0.0  ;;  %v1553_v45 = vmax.f32 %v1425_v16, 0.0 }
 0x1a1   : > { %v528_v35 = vpop.permute.xlu1 %527  ;;  %1846 = vmatpush1.bf16.msra.mxu0 %v1615_v47  ;;  %1959 = vmatpush1.bf16.msra.mxu1 %v1617_v5  ;;  %v1107_v44 = vadd.f32 %v979_v4, %v687_v34  ;;  %v1108_v22 = vadd.f32 %v980_v37, %v688_v19  ;;  %v1109_v20 = vadd.f32 %v981_v29, %v689_v31  ;;  %v2790_v4 = vld [vmem:[%s4249_s3] ss:$8 sps:$4 sm:$0xff]   ;;  %v2793_v37 = vld [vmem:[%s4249_s3 + $0x14] ss:$8 sps:$4 sm:$0xff]   ;;  %v2795_v29 = vld [vmem:[%s4249_s3 + $0x10] ss:$8 sps:$4 sm:$0xff]  }
 0x1a2   : > { %v1110_v23 = vadd.f32 %v982_v38, %v690_v32  ;;  %v691_v53 = vmul.f32 %v3319_v54, %v528_v35  ;;  %v692_v10 = vmul.f32 %v3328_v61, %v528_v35  ;;  %v693_v6 = vmul.f32 %v3331_v62, %v528_v35  ;;  %v2796_v38 = vld [vmem:[%s4249_s3 + $0x24] ss:$8 sps:$4 sm:$0xff]  }
 0x1a3   : > { %v694_v57 = vmul.f32 %v3334_v1, %v528_v35 }
 0x1a6   : > { %v821_v33 = vpop.permute.xlu1 %820 }
 0x1a7   : > { %v983_v2 = vmul.f32 %v4304_v0, %v821_v33  ;;  %v984_v42 = vmul.f32 %v3307_v46, %v821_v33  ;;  %v985_v15 = vmul.f32 %v3311_v48, %v821_v33  ;;  %v986_v47 = vmul.f32 %v3313_v51, %v821_v33 }
 0x1a9   : > { %v1111_v7 = vadd.f32 %v983_v2, %v691_v53  ;;  %v1112_v9 = vadd.f32 %v984_v42, %v692_v10  ;;  %v1113_v28 = vadd.f32 %v985_v15, %v693_v6  ;;  %v1114_v55 = vadd.f32 %v986_v47, %v694_v57 }
 0x1ab   : > { %v1290_v27 = vpop.permute.xlu1 %1289 }
 0x1ac   : > { %v1419_v59 = vadd.f32 %v1290_v27, %v1099_v36  ;;  %v1420_v26 = vadd.f32 %v1290_v27, %v1100_v11  ;;  %v1421_v43 = vadd.f32 %v1290_v27, %v1101_v13  ;;  %v1422_v49 = vadd.f32 %v1290_v27, %v1102_v63  ;;  %v2798_v36 = vld [vmem:[%s4249_s3 + $0x20] ss:$8 sps:$4 sm:$0xff]   ;;  %v2799_v11 = vld [vmem:[%s4249_s3 + $0x34] ss:$8 sps:$4 sm:$0xff]   ;;  %v2801_v13 = vld [vmem:[%s4249_s3 + $0x30] ss:$8 sps:$4 sm:$0xff]  }
 0x1ad   : > { %v2802_v63 = vld [vmem:[%s4249_s3 + $0x44] ss:$8 sps:$4 sm:$0xff]   ;;  %v2810_v27 = vld [vmem:[%s4249_s3 + $0x60] ss:$8 sps:$4 sm:$0xff]  }
 0x1ae   : > { %v1548_v5 = vmax.f32 %v1420_v26, 0.0  ;;  %v1550_v3 = vmax.f32 %v1422_v49, 0.0  ;;  %v1547_v24 = vmax.f32 %v1419_v59, 0.0  ;;  %v1549_v18 = vmax.f32 %v1421_v43, 0.0 }
 0x1af   : > { %v1300_v17 = vpop.permute.xlu1 %1299 }
 0x1b0   : > { %v1427_v0 = vadd.f32 %v1300_v17, %v1107_v44  ;;  %v1428_v14 = vadd.f32 %v1300_v17, %v1108_v22  ;;  %v1429_v46 = vadd.f32 %v1300_v17, %v1109_v20  ;;  %v1430_v56 = vadd.f32 %v1300_v17, %v1110_v23  ;;  %v2811_v44 = vld [vmem:[%s4249_s3 + $0x74] ss:$8 sps:$4 sm:$0xff]   ;;  %v2813_v22 = vld [vmem:[%s4249_s3 + $0x70] ss:$8 sps:$4 sm:$0xff]   ;;  %v1662_v20 = vpop.permute.xlu0 %1661 }
 0x1b1   : > { %v1620_v48 = vpack.c.bf16 %v1552_v41, %v1548_v5  ;;  %v1622_v39 = vpack.c.bf16 %v1554_v21, %v1550_v3  ;;  %v1619_v51 = vpack.c.bf16 %v1551_v25, %v1547_v24  ;;  %v1621_v52 = vpack.c.bf16 %v1553_v45, %v1549_v18  ;;  %v2804_v41 = vld [vmem:[%s4249_s3 + $0x40] ss:$8 sps:$4 sm:$0xff]   ;;  %v2805_v21 = vld [vmem:[%s4249_s3 + $0x54] ss:$8 sps:$4 sm:$0xff]   ;;  %v2807_v25 = vld [vmem:[%s4249_s3 + $0x50] ss:$8 sps:$4 sm:$0xff]  }
 0x1b2   : > { %v1556_v35 = vmax.f32 %v1428_v14, 0.0  ;;  %v1558_v12 = vmax.f32 %v1430_v56, 0.0  ;;  %v1555_v33 = vmax.f32 %v1427_v0, 0.0  ;;  %v1557_v60 = vmax.f32 %v1429_v46, 0.0  ;;  %v2808_v45 = vld [vmem:[%s4249_s3 + $0x64] ss:$8 sps:$4 sm:$0xff]  }
 0x1b3   : > { %1847 = vmatprep.subr.bf16.mxu0 %v1620_v48  ;;  %1960 = vmatprep.subr.bf16.mxu1 %v1622_v39  ;;  %v1305_v54 = vpop.permute.xlu1 %1304 }
 0x1b4   : > { %v1431_v61 = vadd.f32 %v1305_v54, %v1111_v7  ;;  %v1432_v62 = vadd.f32 %v1305_v54, %v1112_v9  ;;  %v1433_v50 = vadd.f32 %v1305_v54, %v1113_v28  ;;  %v1434_v1 = vadd.f32 %v1305_v54, %v1114_v55  ;;  %1848 = vmatpush1.bf16.msra.mxu0 %v1619_v51 }
 0x1b5   : > { %1961 = vmatpush1.bf16.msra.mxu1 %v1621_v52  ;;  %v1672_v52 = vpop.permute.xlu0 %1671 }
 0x1b6   : > { %v1560_v58 = vmax.f32 %v1432_v62, 0.0  ;;  %v1562_v30 = vmax.f32 %v1434_v1, 0.0  ;;  %v1559_v16 = vmax.f32 %v1431_v61, 0.0  ;;  %v1561_v34 = vmax.f32 %v1433_v50, 0.0 }
 0x1b7   : > { %v1667_v23 = vpop.permute.xlu1 %1666 }
 0x1b8   : > { %v1624_v19 = vpack.c.bf16 %v1560_v58, %v1556_v35  ;;  %v1626_v31 = vpack.c.bf16 %v1562_v30, %v1558_v12  ;;  %v1623_v32 = vpack.c.bf16 %v1559_v16, %v1555_v33  ;;  %v1625_v8 = vpack.c.bf16 %v1561_v34, %v1557_v60 }
 0x1ba   : > { %1849 = vmatprep.subr.bf16.mxu0 %v1624_v19  ;;  %1962 = vmatprep.subr.bf16.mxu1 %v1626_v31 }
 0x1bb   : > { %1850 = vmatpush1.bf16.msra.mxu0 %v1623_v32  ;;  %1963 = vmatpush1.bf16.msra.mxu1 %v1625_v8  ;;  %v1677_v7 = vpop.permute.xlu1 %1676 }
 0x1be   : > { %1852 = vmatmul.mubr.bf16.vlgmr.msra.gmra.mrb[0].mxu0 %v2790_v4  ;;  %1965 = vmatmul.mubr.bf16.vlgmr.msra.gmra.mrb[0].mxu1 %v2790_v4 }
 0x1bf   : > { %1861 = vmatprep.mubr.bf16.mxu0 %v2793_v37  ;;  %1974 = vmatprep.mubr.bf16.mxu1 %v2793_v37 }
 0x1c6   : > { %1862 = vmatmul.mubr.bf16.gmra.mrb[4].mxu0 %v2795_v29  ;;  %1975 = vmatmul.mubr.bf16.gmra.mrb[4].mxu1 %v2795_v29 }
 0x1c7   : > { %1871 = vmatprep.mubr.bf16.mxu0 %v2796_v38  ;;  %1984 = vmatprep.mubr.bf16.mxu1 %v2796_v38 }
 0x1ce   : > { %1872 = vmatmul.mubr.bf16.gmra.mrb[8].mxu0 %v2798_v36  ;;  %1985 = vmatmul.mubr.bf16.gmra.mrb[8].mxu1 %v2798_v36 }
 0x1cf   : > { %1881 = vmatprep.mubr.bf16.mxu0 %v2799_v11  ;;  %1994 = vmatprep.mubr.bf16.mxu1 %v2799_v11 }
 0x1d6   : > { %1882 = vmatmul.mubr.bf16.gmra.mrb[12].mxu0 %v2801_v13  ;;  %1995 = vmatmul.mubr.bf16.gmra.mrb[12].mxu1 %v2801_v13 }
 0x1d7   : > { %1891 = vmatprep.mubr.bf16.mxu0 %v2802_v63  ;;  %2004 = vmatprep.mubr.bf16.mxu1 %v2802_v63 }
 0x1de   : > { %1892 = vmatmul.mubr.bf16.gmra.mrb[16].mxu0 %v2804_v41  ;;  %2005 = vmatmul.mubr.bf16.gmra.mrb[16].mxu1 %v2804_v41  ;;  %v1682_v41 = vpop.permute.xlu0 %1681 }
 0x1df   : > { %1901 = vmatprep.mubr.bf16.mxu0 %v2805_v21  ;;  %2014 = vmatprep.mubr.bf16.mxu1 %v2805_v21  ;;  %v1687_v21 = vpop.permute.xlu1 %1686 }
 0x1e6   : > { %1902 = vmatmul.mubr.bf16.gmra.mrb[20].mxu0 %v2807_v25  ;;  %2015 = vmatmul.mubr.bf16.gmra.mrb[20].mxu1 %v2807_v25 }
 0x1e7   : > { %1911 = vmatprep.mubr.bf16.mxu0 %v2808_v45  ;;  %2024 = vmatprep.mubr.bf16.mxu1 %v2808_v45 }
 0x1ee   : > { %1912 = vmatmul.mubr.bf16.gmra.mrb[24].mxu0 %v2810_v27  ;;  %2025 = vmatmul.mubr.bf16.gmra.mrb[24].mxu1 %v2810_v27 }
 0x1ef   : > { %1921 = vmatprep.mubr.bf16.mxu0 %v2811_v44  ;;  %2034 = vmatprep.mubr.bf16.mxu1 %v2811_v44 }
 0x1f6   : > { %1922 = vmatmul.mubr.bf16.gmra.mrb[28].mxu0 %v2813_v22  ;;  %2035 = vmatmul.mubr.bf16.gmra.mrb[28].mxu1 %v2813_v22 }
 0x1f7   : > { %2253 = vmatprep.mubr.bf16.mxu0 %v4296_v40  ;;  %2326 = vmatprep.mubr.bf16.mxu1 %v4296_v40 }
 0x291   : > { %v1853_v59 = vpop.f32.mrb[0].mxu0  ;;  %v1966_v26 = vpop.f32.mrb[0].mxu1 }
 0x292   : > { %v1854_v43 = vadd.f32 %v1853_v59, %v1662_v20  ;;  %v1967_v49 = vadd.f32 %v1966_v26, %v1662_v20  ;;  %v1855_v2 = vpop.f32.mrb[1].mxu0  ;;  %v1968_v42 = vpop.f32.mrb[1].mxu1 }
 0x293   : > { %v1856_v15 = vadd.f32 %v1855_v2, %v1662_v20  ;;  %v1969_v47 = vadd.f32 %v1968_v42, %v1662_v20  ;;  %v1857_v5 = vpop.f32.mrb[2].mxu0  ;;  %v1970_v3 = vpop.f32.mrb[2].mxu1 }
 0x294   : > { %v1858_v24 = vadd.f32 %v1857_v5, %v1667_v23  ;;  %v1971_v18 = vadd.f32 %v1970_v3, %v1667_v23  ;;  %v1859_v53 = vpop.f32.mrb[3].mxu0  ;;  %v1972_v10 = vpop.f32.mrb[3].mxu1  ;;  %v2045_v17 = vmax.f32 %v1854_v43, 0.0  ;;  %v2047_v0 = vmax.f32 %v1967_v49, 0.0 }
 0x295   : > { %v1860_v6 = vadd.f32 %v1859_v53, %v1667_v23  ;;  %v1973_v57 = vadd.f32 %v1972_v10, %v1667_v23  ;;  %v2046_v56 = vmax.f32 %v1856_v15, 0.0  ;;  %v2048_v48 = vmax.f32 %v1969_v47, 0.0 }
 0x296   : > { %v2049_v14 = vmax.f32 %v1858_v24, 0.0  ;;  %v2051_v46 = vmax.f32 %v1971_v18, 0.0 }
 0x297   : > { %v2050_v39 = vmax.f32 %v1860_v6, 0.0  ;;  %v2052_v51 = vmax.f32 %v1973_v57, 0.0 }
 0x298   : > { %v2109_v9 = vpack.c.bf16 %v2049_v14, %v2045_v17  ;;  %v2111_v28 = vpack.c.bf16 %v2051_v46, %v2047_v0 }
 0x299   : > { %v2110_v55 = vpack.c.bf16 %v2050_v39, %v2046_v56  ;;  %v2112_v54 = vpack.c.bf16 %v2052_v51, %v2048_v48  ;;  %v1863_v61 = vpop.f32.mrb[4].mxu0  ;;  %v1976_v62 = vpop.f32.mrb[4].mxu1 }
 0x29a   : > { %v1864_v50 = vadd.f32 %v1863_v61, %v1672_v52  ;;  %v1977_v1 = vadd.f32 %v1976_v62, %v1672_v52  ;;  %v1865_v35 = vpop.f32.mrb[5].mxu0  ;;  %v1978_v12 = vpop.f32.mrb[5].mxu1 }
 0x29b   : > { %v1866_v33 = vadd.f32 %v1865_v35, %v1672_v52  ;;  %v1979_v60 = vadd.f32 %v1978_v12, %v1672_v52  ;;  %v1867_v58 = vpop.f32.mrb[6].mxu0  ;;  %v1980_v30 = vpop.f32.mrb[6].mxu1  ;;  %2221 = vmatprep.subr.bf16.mxu0 %v2110_v55  ;;  %2294 = vmatprep.subr.bf16.mxu1 %v2112_v54 }
 0x29c   : > { %v1868_v16 = vadd.f32 %v1867_v58, %v1677_v7  ;;  %v1981_v34 = vadd.f32 %v1980_v30, %v1677_v7  ;;  %v1869_v19 = vpop.f32.mrb[7].mxu0  ;;  %v1982_v31 = vpop.f32.mrb[7].mxu1  ;;  %2222 = vmatpush1.bf16.msra.mxu0 %v2109_v9  ;;  %2295 = vmatpush1.bf16.msra.mxu1 %v2111_v28  ;;  %v2053_v4 = vmax.f32 %v1864_v50, 0.0  ;;  %v2055_v37 = vmax.f32 %v1977_v1, 0.0 }
 0x29d   : > { %v1870_v32 = vadd.f32 %v1869_v19, %v1677_v7  ;;  %v1983_v8 = vadd.f32 %v1982_v31, %v1677_v7  ;;  %v2054_v36 = vmax.f32 %v1866_v33, 0.0  ;;  %v2056_v11 = vmax.f32 %v1979_v60, 0.0  ;;  %v1692_v48 = vpop.permute.xlu0 %1691  ;;  %v1697_v39 = vpop.permute.xlu1 %1696 }
 0x29e   : > { %v2057_v29 = vmax.f32 %v1868_v16, 0.0  ;;  %v2059_v38 = vmax.f32 %v1981_v34, 0.0 }
 0x29f   : > { %v2058_v13 = vmax.f32 %v1870_v32, 0.0  ;;  %v2060_v63 = vmax.f32 %v1983_v8, 0.0 }
 0x2a0   : > { %v2113_v25 = vpack.c.bf16 %v2057_v29, %v2053_v4  ;;  %v2115_v45 = vpack.c.bf16 %v2059_v38, %v2055_v37 }
 0x2a1   : > { %v2114_v27 = vpack.c.bf16 %v2058_v13, %v2054_v36  ;;  %v2116_v44 = vpack.c.bf16 %v2060_v63, %v2056_v11  ;;  %v1873_v22 = vpop.f32.mrb[8].mxu0  ;;  %v1986_v20 = vpop.f32.mrb[8].mxu1 }
 0x2a2   : > { %v1874_v23 = vadd.f32 %v1873_v22, %v1682_v41  ;;  %v1987_v59 = vadd.f32 %v1986_v20, %v1682_v41  ;;  %v1875_v26 = vpop.f32.mrb[9].mxu0  ;;  %v1988_v43 = vpop.f32.mrb[9].mxu1 }
 0x2a3   : > { %v1876_v49 = vadd.f32 %v1875_v26, %v1682_v41  ;;  %v1989_v2 = vadd.f32 %v1988_v43, %v1682_v41  ;;  %v1877_v42 = vpop.f32.mrb[10].mxu0  ;;  %v1990_v15 = vpop.f32.mrb[10].mxu1  ;;  %2223 = vmatprep.subr.bf16.mxu0 %v2114_v27  ;;  %2296 = vmatprep.subr.bf16.mxu1 %v2116_v44 }
 0x2a4   : > { %v1878_v47 = vadd.f32 %v1877_v42, %v1687_v21  ;;  %v1991_v5 = vadd.f32 %v1990_v15, %v1687_v21  ;;  %v1879_v3 = vpop.f32.mrb[11].mxu0  ;;  %v1992_v24 = vpop.f32.mrb[11].mxu1  ;;  %2224 = vmatpush1.bf16.msra.mxu0 %v2113_v25  ;;  %2297 = vmatpush1.bf16.msra.mxu1 %v2115_v45  ;;  %v2061_v10 = vmax.f32 %v1874_v23, 0.0  ;;  %v2063_v6 = vmax.f32 %v1987_v59, 0.0 }
 0x2a5   : > { %v1880_v18 = vadd.f32 %v1879_v3, %v1687_v21  ;;  %v1993_v53 = vadd.f32 %v1992_v24, %v1687_v21  ;;  %v2062_v0 = vmax.f32 %v1876_v49, 0.0  ;;  %v2064_v14 = vmax.f32 %v1989_v2, 0.0  ;;  %v1702_v11 = vpop.permute.xlu0 %1701  ;;  %v1707_v13 = vpop.permute.xlu1 %1706 }
 0x2a6   : > { %v2065_v57 = vmax.f32 %v1878_v47, 0.0  ;;  %v2067_v17 = vmax.f32 %v1991_v5, 0.0 }
 0x2a7   : > { %v2066_v46 = vmax.f32 %v1880_v18, 0.0  ;;  %v2068_v56 = vmax.f32 %v1993_v53, 0.0 }
 0x2a8   : > { %v2117_v51 = vpack.c.bf16 %v2065_v57, %v2061_v10  ;;  %v2119_v52 = vpack.c.bf16 %v2067_v17, %v2063_v6 }
 0x2a9   : > { %v2118_v7 = vpack.c.bf16 %v2066_v46, %v2062_v0  ;;  %v2120_v9 = vpack.c.bf16 %v2068_v56, %v2064_v14  ;;  %v1883_v28 = vpop.f32.mrb[12].mxu0  ;;  %v1996_v55 = vpop.f32.mrb[12].mxu1 }
 0x2aa   : > { %v1884_v54 = vadd.f32 %v1883_v28, %v1692_v48  ;;  %v1997_v61 = vadd.f32 %v1996_v55, %v1692_v48  ;;  %v1885_v62 = vpop.f32.mrb[13].mxu0  ;;  %v1998_v50 = vpop.f32.mrb[13].mxu1 }
 0x2ab   : > { %v1886_v1 = vadd.f32 %v1885_v62, %v1692_v48  ;;  %v1999_v35 = vadd.f32 %v1998_v50, %v1692_v48  ;;  %v1887_v12 = vpop.f32.mrb[14].mxu0  ;;  %v2000_v33 = vpop.f32.mrb[14].mxu1  ;;  %2225 = vmatprep.subr.bf16.mxu0 %v2118_v7  ;;  %2298 = vmatprep.subr.bf16.mxu1 %v2120_v9 }
 0x2ac   : > { %v1888_v60 = vadd.f32 %v1887_v12, %v1697_v39  ;;  %v2001_v58 = vadd.f32 %v2000_v33, %v1697_v39  ;;  %v1889_v30 = vpop.f32.mrb[15].mxu0  ;;  %v2002_v16 = vpop.f32.mrb[15].mxu1  ;;  %2226 = vmatpush1.bf16.msra.mxu0 %v2117_v51  ;;  %2299 = vmatpush1.bf16.msra.mxu1 %v2119_v52  ;;  %v2069_v31 = vmax.f32 %v1884_v54, 0.0  ;;  %v2071_v32 = vmax.f32 %v1997_v61, 0.0 }
 0x2ad   : > { %v1890_v34 = vadd.f32 %v1889_v30, %v1697_v39  ;;  %v2003_v19 = vadd.f32 %v2002_v16, %v1697_v39  ;;  %v2070_v37 = vmax.f32 %v1886_v1, 0.0  ;;  %v2072_v29 = vmax.f32 %v1999_v35, 0.0  ;;  %v1712_v14 = vpop.permute.xlu0 %1711  ;;  %v1717_v46 = vpop.permute.xlu1 %1716 }
 0x2ae   : > { %v2073_v8 = vmax.f32 %v1888_v60, 0.0  ;;  %v2075_v4 = vmax.f32 %v2001_v58, 0.0 }
 0x2af   : > { %v2074_v38 = vmax.f32 %v1890_v34, 0.0  ;;  %v2076_v36 = vmax.f32 %v2003_v19, 0.0 }
 0x2b0   : > { %v2121_v63 = vpack.c.bf16 %v2073_v8, %v2069_v31  ;;  %v2123_v41 = vpack.c.bf16 %v2075_v4, %v2071_v32 }
 0x2b1   : > { %v2122_v21 = vpack.c.bf16 %v2074_v38, %v2070_v37  ;;  %v2124_v25 = vpack.c.bf16 %v2076_v36, %v2072_v29  ;;  %v1893_v45 = vpop.f32.mrb[16].mxu0  ;;  %v2006_v27 = vpop.f32.mrb[16].mxu1 }
 0x2b2   : > { %v1894_v44 = vadd.f32 %v1893_v45, %v1702_v11  ;;  %v2007_v22 = vadd.f32 %v2006_v27, %v1702_v11  ;;  %v1895_v20 = vpop.f32.mrb[17].mxu0  ;;  %v2008_v23 = vpop.f32.mrb[17].mxu1 }
 0x2b3   : > { %v1896_v59 = vadd.f32 %v1895_v20, %v1702_v11  ;;  %v2009_v26 = vadd.f32 %v2008_v23, %v1702_v11  ;;  %v1897_v43 = vpop.f32.mrb[18].mxu0  ;;  %v2010_v49 = vpop.f32.mrb[18].mxu1  ;;  %2227 = vmatprep.subr.bf16.mxu0 %v2122_v21  ;;  %2300 = vmatprep.subr.bf16.mxu1 %v2124_v25 }
 0x2b4   : > { %v1898_v2 = vadd.f32 %v1897_v43, %v1707_v13  ;;  %v2011_v42 = vadd.f32 %v2010_v49, %v1707_v13  ;;  %v1899_v15 = vpop.f32.mrb[19].mxu0  ;;  %v2012_v47 = vpop.f32.mrb[19].mxu1  ;;  %2228 = vmatpush1.bf16.msra.mxu0 %v2121_v63  ;;  %2301 = vmatpush1.bf16.msra.mxu1 %v2123_v41  ;;  %v2077_v24 = vmax.f32 %v1894_v44, 0.0  ;;  %v2079_v18 = vmax.f32 %v2007_v22, 0.0 }
 0x2b5   : > { %v1900_v5 = vadd.f32 %v1899_v15, %v1707_v13  ;;  %v2013_v3 = vadd.f32 %v2012_v47, %v1707_v13  ;;  %v2078_v6 = vmax.f32 %v1896_v59, 0.0  ;;  %v2080_v57 = vmax.f32 %v2009_v26, 0.0  ;;  %v1722_v29 = vpop.permute.xlu0 %1721  ;;  %v1727_v38 = vpop.permute.xlu1 %1726 }
 0x2b6   : > { %v2081_v53 = vmax.f32 %v1898_v2, 0.0  ;;  %v2083_v10 = vmax.f32 %v2011_v42, 0.0 }
 0x2b7   : > { %v2082_v17 = vmax.f32 %v1900_v5, 0.0  ;;  %v2084_v0 = vmax.f32 %v2013_v3, 0.0 }
 0x2b8   : > { %v2125_v56 = vpack.c.bf16 %v2081_v53, %v2077_v24  ;;  %v2127_v48 = vpack.c.bf16 %v2083_v10, %v2079_v18 }
 0x2b9   : > { %v2126_v39 = vpack.c.bf16 %v2082_v17, %v2078_v6  ;;  %v2128_v51 = vpack.c.bf16 %v2084_v0, %v2080_v57  ;;  %v1903_v52 = vpop.f32.mrb[20].mxu0  ;;  %v2016_v7 = vpop.f32.mrb[20].mxu1 }
 0x2ba   : > { %v1904_v9 = vadd.f32 %v1903_v52, %v1712_v14  ;;  %v2017_v28 = vadd.f32 %v2016_v7, %v1712_v14  ;;  %v1905_v55 = vpop.f32.mrb[21].mxu0  ;;  %v2018_v54 = vpop.f32.mrb[21].mxu1 }
 0x2bb   : > { %v1906_v61 = vadd.f32 %v1905_v55, %v1712_v14  ;;  %v2019_v62 = vadd.f32 %v2018_v54, %v1712_v14  ;;  %v1907_v50 = vpop.f32.mrb[22].mxu0  ;;  %v2020_v1 = vpop.f32.mrb[22].mxu1  ;;  %2229 = vmatprep.subr.bf16.mxu0 %v2126_v39  ;;  %2302 = vmatprep.subr.bf16.mxu1 %v2128_v51 }
 0x2bc   : > { %v1908_v35 = vadd.f32 %v1907_v50, %v1717_v46  ;;  %v2021_v12 = vadd.f32 %v2020_v1, %v1717_v46  ;;  %v1909_v33 = vpop.f32.mrb[23].mxu0  ;;  %v2022_v60 = vpop.f32.mrb[23].mxu1  ;;  %2230 = vmatpush1.bf16.msra.mxu0 %v2125_v56  ;;  %2303 = vmatpush1.bf16.msra.mxu1 %v2127_v48  ;;  %v2085_v16 = vmax.f32 %v1904_v9, 0.0  ;;  %v2087_v34 = vmax.f32 %v2017_v28, 0.0 }
 0x2bd   : > { %v1910_v58 = vadd.f32 %v1909_v33, %v1717_v46  ;;  %v2023_v30 = vadd.f32 %v2022_v60, %v1717_v46  ;;  %v2086_v32 = vmax.f32 %v1906_v61, 0.0  ;;  %v2088_v8 = vmax.f32 %v2019_v62, 0.0  ;;  %v1732_v57 = vpop.permute.xlu0 %1731  ;;  %v1737_v17 = vpop.permute.xlu1 %1736 }
 0x2be   : > { %v2089_v19 = vmax.f32 %v1908_v35, 0.0  ;;  %v2091_v31 = vmax.f32 %v2021_v12, 0.0 }
 0x2bf   : > { %v2090_v4 = vmax.f32 %v1910_v58, 0.0  ;;  %v2092_v37 = vmax.f32 %v2023_v30, 0.0 }
 0x2c0   : > { %v2129_v36 = vpack.c.bf16 %v2089_v19, %v2085_v16  ;;  %v2131_v11 = vpack.c.bf16 %v2091_v31, %v2087_v34 }
 0x2c1   : > { %v2130_v13 = vpack.c.bf16 %v2090_v4, %v2086_v32  ;;  %v2132_v63 = vpack.c.bf16 %v2092_v37, %v2088_v8  ;;  %v1913_v41 = vpop.f32.mrb[24].mxu0  ;;  %v2026_v21 = vpop.f32.mrb[24].mxu1 }
 0x2c2   : > { %v1914_v25 = vadd.f32 %v1913_v41, %v1722_v29  ;;  %v2027_v45 = vadd.f32 %v2026_v21, %v1722_v29  ;;  %v1915_v27 = vpop.f32.mrb[25].mxu0  ;;  %v2028_v44 = vpop.f32.mrb[25].mxu1 }
 0x2c3   : > { %v1916_v22 = vadd.f32 %v1915_v27, %v1722_v29  ;;  %v2029_v20 = vadd.f32 %v2028_v44, %v1722_v29  ;;  %v1917_v23 = vpop.f32.mrb[26].mxu0  ;;  %v2030_v59 = vpop.f32.mrb[26].mxu1  ;;  %2231 = vmatprep.subr.bf16.mxu0 %v2130_v13  ;;  %2304 = vmatprep.subr.bf16.mxu1 %v2132_v63  ;;  %v2817_v13 = vld [vmem:[%s4251_s5 + $0x18] sm:$0xff]  }
 0x2c4   : > { %v1918_v26 = vadd.f32 %v1917_v23, %v1727_v38  ;;  %v2031_v43 = vadd.f32 %v2030_v59, %v1727_v38  ;;  %v1919_v49 = vpop.f32.mrb[27].mxu0  ;;  %v2032_v2 = vpop.f32.mrb[27].mxu1  ;;  %2232 = vmatpush1.bf16.msra.mxu0 %v2129_v36  ;;  %2305 = vmatpush1.bf16.msra.mxu1 %v2131_v11  ;;  %v2093_v47 = vmax.f32 %v1914_v25, 0.0  ;;  %v2095_v5 = vmax.f32 %v2027_v45, 0.0  ;;  %v2815_v36 = vld [vmem:[%s4251_s5 + $0x8] sm:$0xff]   ;;  %v2816_v11 = vld [vmem:[%s4251_s5 + $0x10] sm:$0xff]  }
 0x2c5   : > { %v1920_v42 = vadd.f32 %v1919_v49, %v1727_v38  ;;  %v2033_v15 = vadd.f32 %v2032_v2, %v1727_v38  ;;  %v2094_v18 = vmax.f32 %v1916_v22, 0.0  ;;  %v2096_v53 = vmax.f32 %v2029_v20, 0.0  ;;  %v2814_v38 = vld [vmem:[%s4251_s5] sm:$0xff]   ;;  %v2160_v63 = vpop.permute.xlu0 %2159  ;;  %v2165_v41 = vpop.permute.xlu1 %2164 }
 0x2c6   : > { %v2097_v3 = vmax.f32 %v1918_v26, 0.0  ;;  %v2099_v24 = vmax.f32 %v2031_v43, 0.0 }
 0x2c7   : > { %v2098_v10 = vmax.f32 %v1920_v42, 0.0  ;;  %v2100_v6 = vmax.f32 %v2033_v15, 0.0 }
 0x2c8   : > { %v2133_v0 = vpack.c.bf16 %v2097_v3, %v2093_v47  ;;  %v2135_v14 = vpack.c.bf16 %v2099_v24, %v2095_v5 }
 0x2c9   : > { %v2134_v46 = vpack.c.bf16 %v2098_v10, %v2094_v18  ;;  %v2136_v56 = vpack.c.bf16 %v2100_v6, %v2096_v53  ;;  %v1923_v48 = vpop.f32.mrb[28].mxu0  ;;  %v2036_v39 = vpop.f32.mrb[28].mxu1 }
 0x2ca   : > { %v1924_v51 = vadd.f32 %v1923_v48, %v1732_v57  ;;  %v2037_v52 = vadd.f32 %v2036_v39, %v1732_v57  ;;  %v1925_v7 = vpop.f32.mrb[29].mxu0  ;;  %v2038_v9 = vpop.f32.mrb[29].mxu1 }
 0x2cb   : > { %v1926_v28 = vadd.f32 %v1925_v7, %v1732_v57  ;;  %v2039_v55 = vadd.f32 %v2038_v9, %v1732_v57  ;;  %v1927_v54 = vpop.f32.mrb[30].mxu0  ;;  %v2040_v61 = vpop.f32.mrb[30].mxu1  ;;  %2233 = vmatprep.subr.bf16.mxu0 %v2134_v46  ;;  %2306 = vmatprep.subr.bf16.mxu1 %v2136_v56 }
 0x2cc   : > { %v1928_v62 = vadd.f32 %v1927_v54, %v1737_v17  ;;  %v2041_v50 = vadd.f32 %v2040_v61, %v1737_v17  ;;  %v1929_v1 = vpop.f32.mrb[31].mxu0  ;;  %v2042_v35 = vpop.f32.mrb[31].mxu1  ;;  %2234 = vmatpush1.bf16.msra.mxu0 %v2133_v0  ;;  %2307 = vmatpush1.bf16.msra.mxu1 %v2135_v14  ;;  %v2101_v60 = vmax.f32 %v1924_v51, 0.0  ;;  %v2103_v58 = vmax.f32 %v2037_v52, 0.0 }
 0x2cd   : > { %v1930_v12 = vadd.f32 %v1929_v1, %v1737_v17  ;;  %v2043_v33 = vadd.f32 %v2042_v35, %v1737_v17  ;;  %v2102_v34 = vmax.f32 %v1926_v28, 0.0  ;;  %v2104_v19 = vmax.f32 %v2039_v55, 0.0  ;;  %v2170_v21 = vpop.permute.xlu0 %2169  ;;  %v2175_v25 = vpop.permute.xlu1 %2174 }
 0x2ce   : > { %v2105_v30 = vmax.f32 %v1928_v62, 0.0  ;;  %v2107_v16 = vmax.f32 %v2041_v50, 0.0 }
 0x2cf   : > { %v2106_v31 = vmax.f32 %v1930_v12, 0.0  ;;  %v2108_v32 = vmax.f32 %v2043_v33, 0.0 }
 0x2d0   : > { %v2137_v8 = vpack.c.bf16 %v2105_v30, %v2101_v60  ;;  %v2139_v4 = vpack.c.bf16 %v2107_v16, %v2103_v58 }
 0x2d1   : > { %v2138_v37 = vpack.c.bf16 %v2106_v31, %v2102_v34  ;;  %v2140_v29 = vpack.c.bf16 %v2108_v32, %v2104_v19  ;;  %v2410_v45 = vpop.permute.xlu0 %2409  ;;  %v2415_v27 = vpop.permute.xlu1 %2414 }
 0x2d3   : > { %2235 = vmatprep.subr.bf16.mxu0 %v2138_v37  ;;  %2308 = vmatprep.subr.bf16.mxu1 %v2140_v29 }
 0x2d4   : > { %2236 = vmatpush1.bf16.msra.mxu0 %v2137_v8  ;;  %2309 = vmatpush1.bf16.msra.mxu1 %v2139_v4 }
 0x2d5   : > { %v4172_v44 = vpop.permute.xlu0 %2179  ;;  %v4174_v22 = vpop.permute.xlu1 %2419 }
 0x2d7   : > { %2254 = vmatmul.mubr.bf16.vlgmr.msra.gmra.mrb[32].mxu0 %v2814_v38  ;;  %2327 = vmatmul.mubr.bf16.vlgmr.msra.gmra.mrb[32].mxu1 %v2814_v38 }
 0x2d8   : > { %2263 = vmatprep.mubr.bf16.mxu0 %v4296_v40  ;;  %2336 = vmatprep.mubr.bf16.mxu1 %v4296_v40 }
 0x2d9   : > { %v4176_v48 = vpop.permute.xlu0 %2184  ;;  %v2425_v39 = vpop.permute.xlu1 %2424 }
 0x2df   : > { %2264 = vmatmul.mubr.bf16.gmra.mrb[36].mxu0 %v2815_v36  ;;  %2337 = vmatmul.mubr.bf16.gmra.mrb[36].mxu1 %v2815_v36 }
 0x2e0   : > { %2273 = vmatprep.mubr.bf16.mxu0 %v4296_v40  ;;  %2346 = vmatprep.mubr.bf16.mxu1 %v4296_v40 }
 0x2e7   : > { %2274 = vmatmul.mubr.bf16.gmra.mrb[40].mxu0 %v2816_v11  ;;  %2347 = vmatmul.mubr.bf16.gmra.mrb[40].mxu1 %v2816_v11 }
 0x2e8   : > { %2283 = vmatprep.mubr.bf16.mxu0 %v4296_v40  ;;  %2356 = vmatprep.mubr.bf16.mxu1 %v4296_v40 }
 0x2ef   : > { %2284 = vmatmul.mubr.bf16.gmra.mrb[44].mxu0 %v2817_v13  ;;  %2357 = vmatmul.mubr.bf16.gmra.mrb[44].mxu1 %v2817_v13 }
 0x3aa   : > { %v2255_v20 = vpop.f32.mrb[32].mxu0  ;;  %v2328_v23 = vpop.f32.mrb[32].mxu1 }
 0x3ab   : > { %v2256_v59 = vadd.f32 %v2255_v20, %v2160_v63  ;;  %v2329_v40 = vadd.f32 %v2328_v23, %v2160_v63  ;;  %v2257_v26 = vpop.f32.mrb[33].mxu0  ;;  %v2330_v43 = vpop.f32.mrb[33].mxu1 }
 0x3ac   : > { %v2258_v49 = vadd.f32 %v2257_v26, %v2160_v63  ;;  %v2331_v2 = vadd.f32 %v2330_v43, %v2160_v63  ;;  %v2259_v42 = vpop.f32.mrb[34].mxu0  ;;  %v2332_v15 = vpop.f32.mrb[34].mxu1 }
 0x3ad   : > { %v2367_v47 = vmax.f32 %v2256_v59, 0.0  ;;  %v2369_v5 = vmax.f32 %v2329_v40, 0.0  ;;  %v2260_v3 = vadd.f32 %v2259_v42, %v2165_v41  ;;  %v2333_v24 = vadd.f32 %v2332_v15, %v2165_v41  ;;  %v2261_v18 = vpop.f32.mrb[35].mxu0  ;;  %v2334_v53 = vpop.f32.mrb[35].mxu1 }
 0x3ae   : > { %v2368_v10 = vmax.f32 %v2258_v49, 0.0  ;;  %v2370_v6 = vmax.f32 %v2331_v2, 0.0  ;;  %v2262_v57 = vadd.f32 %v2261_v18, %v2165_v41  ;;  %v2335_v17 = vadd.f32 %v2334_v53, %v2165_v41  ;;  %v4182_v43 = vpop.permute.xlu0 %2189  ;;  %v2430_v49 = vpop.permute.xlu1 %2429 }
 0x3af   : > { %v2371_v0 = vmax.f32 %v2260_v3, 0.0  ;;  %v2373_v14 = vmax.f32 %v2333_v24, 0.0  ;;  %v2447_v51 = vmul.f32 %v2410_v45, %v2367_v47  ;;  %v2449_v52 = vmul.f32 %v2410_v45, %v2369_v5 }
 0x3b0   : > { %v2372_v46 = vmax.f32 %v2262_v57, 0.0  ;;  %v2374_v56 = vmax.f32 %v2335_v17, 0.0  ;;  %v2448_v28 = vmul.f32 %v2410_v45, %v2368_v10  ;;  %v2450_v55 = vmul.f32 %v2410_v45, %v2370_v6 }
 0x3b1   : > { %v2451_v7 = vmul.f32 %v2415_v27, %v2371_v0  ;;  %v2453_v9 = vmul.f32 %v2415_v27, %v2373_v14 }
 0x3b2   : > { %v2452_v54 = vmul.f32 %v2415_v27, %v2372_v46  ;;  %v2454_v61 = vmul.f32 %v2415_v27, %v2374_v56  ;;  %v2265_v62 = vpop.f32.mrb[36].mxu0  ;;  %v2338_v50 = vpop.f32.mrb[36].mxu1 }
 0x3b3   : > { %v2479_v1 = vadd.f32 %v2451_v7, %v2447_v51  ;;  %v2505_v35 = vadd.f32 %v2453_v9, %v2449_v52  ;;  %v2266_v12 = vadd.f32 %v2265_v62, %v2170_v21  ;;  %v2339_v33 = vadd.f32 %v2338_v50, %v2170_v21  ;;  %v2267_v60 = vpop.f32.mrb[37].mxu0  ;;  %v2340_v58 = vpop.f32.mrb[37].mxu1 }
 0x3b4   : > { %v2492_v30 = vadd.f32 %v2452_v54, %v2448_v28  ;;  %v2518_v16 = vadd.f32 %v2454_v61, %v2450_v55  ;;  %v2268_v34 = vadd.f32 %v2267_v60, %v2170_v21  ;;  %v2341_v19 = vadd.f32 %v2340_v58, %v2170_v21  ;;  %v2269_v31 = vpop.f32.mrb[38].mxu0  ;;  %v2342_v32 = vpop.f32.mrb[38].mxu1 }
 0x3b5   : > { %v2375_v8 = vmax.f32 %v2266_v12, 0.0  ;;  %v2377_v4 = vmax.f32 %v2339_v33, 0.0  ;;  %v2270_v37 = vadd.f32 %v2269_v31, %v2175_v25  ;;  %v2343_v29 = vadd.f32 %v2342_v32, %v2175_v25  ;;  %v2271_v38 = vpop.f32.mrb[39].mxu0  ;;  %v2344_v36 = vpop.f32.mrb[39].mxu1 }
 0x3b6   : > { %v2376_v11 = vmax.f32 %v2268_v34, 0.0  ;;  %v2378_v13 = vmax.f32 %v2341_v19, 0.0  ;;  %v2272_v63 = vadd.f32 %v2271_v38, %v2175_v25  ;;  %v2345_v41 = vadd.f32 %v2344_v36, %v2175_v25  ;;  %v2195_v58 = vpop.permute.xlu0 %2194 }
 0x3b7   : > { %v2455_v45 = vmul.f32 %v4174_v22, %v2375_v8  ;;  %v2457_v27 = vmul.f32 %v4174_v22, %v2377_v4  ;;  %v2379_v20 = vmax.f32 %v2270_v37, 0.0  ;;  %v2381_v23 = vmax.f32 %v2343_v29, 0.0 }
 0x3b8   : > { %v2456_v21 = vmul.f32 %v4174_v22, %v2376_v11  ;;  %v2458_v59 = vmul.f32 %v4174_v22, %v2378_v13  ;;  %v2380_v40 = vmax.f32 %v2272_v63, 0.0  ;;  %v2382_v26 = vmax.f32 %v2345_v41, 0.0 }
 0x3b9   : > { %v2480_v2 = vadd.f32 %v2479_v1, %v2455_v45  ;;  %v2506_v42 = vadd.f32 %v2505_v35, %v2457_v27  ;;  %v2459_v15 = vmul.f32 %v2425_v39, %v2379_v20  ;;  %v2461_v47 = vmul.f32 %v2425_v39, %v2381_v23 }
 0x3ba   : > { %v2493_v25 = vadd.f32 %v2492_v30, %v2456_v21  ;;  %v2519_v5 = vadd.f32 %v2518_v16, %v2458_v59  ;;  %v2460_v3 = vmul.f32 %v2425_v39, %v2380_v40  ;;  %v2462_v24 = vmul.f32 %v2425_v39, %v2382_v26  ;;  %v2275_v18 = vpop.f32.mrb[40].mxu0  ;;  %v2348_v53 = vpop.f32.mrb[40].mxu1 }
 0x3bb   : > { %v2481_v10 = vadd.f32 %v2480_v2, %v2459_v15  ;;  %v2507_v6 = vadd.f32 %v2506_v42, %v2461_v47  ;;  %v2276_v57 = vadd.f32 %v2275_v18, %v4172_v44  ;;  %v2349_v22 = vadd.f32 %v2348_v53, %v4172_v44  ;;  %v2277_v17 = vpop.f32.mrb[41].mxu0  ;;  %v2350_v0 = vpop.f32.mrb[41].mxu1 }
 0x3bc   : > { %v2494_v14 = vadd.f32 %v2493_v25, %v2460_v3  ;;  %v2520_v46 = vadd.f32 %v2519_v5, %v2462_v24  ;;  %v2278_v56 = vadd.f32 %v2277_v17, %v4172_v44  ;;  %v2351_v51 = vadd.f32 %v2350_v0, %v4172_v44  ;;  %v2279_v52 = vpop.f32.mrb[42].mxu0  ;;  %v2352_v7 = vpop.f32.mrb[42].mxu1 }
 0x3bd   : > { %v2383_v9 = vmax.f32 %v2276_v57, 0.0  ;;  %v2385_v39 = vmax.f32 %v2349_v22, 0.0  ;;  %v2280_v28 = vadd.f32 %v2279_v52, %v4176_v48  ;;  %v2353_v55 = vadd.f32 %v2352_v7, %v4176_v48  ;;  %v2281_v54 = vpop.f32.mrb[43].mxu0  ;;  %v2354_v61 = vpop.f32.mrb[43].mxu1 }
 0x3be   : > { %v2384_v62 = vmax.f32 %v2278_v56, 0.0  ;;  %v2386_v50 = vmax.f32 %v2351_v51, 0.0  ;;  %v2282_v1 = vadd.f32 %v2281_v54, %v4176_v48  ;;  %v2355_v35 = vadd.f32 %v2354_v61, %v4176_v48  ;;  %v2435_v30 = vpop.permute.xlu1 %2434  ;;  %v2440_v24 = vpop.permute.xlu0 %2439 }
 0x3bf   : > { %v2463_v12 = vmul.f32 %v2430_v49, %v2383_v9  ;;  %v2465_v33 = vmul.f32 %v2430_v49, %v2385_v39  ;;  %v2387_v60 = vmax.f32 %v2280_v28, 0.0  ;;  %v2389_v44 = vmax.f32 %v2353_v55, 0.0 }
 0x3c0   : > { %v2464_v16 = vmul.f32 %v2430_v49, %v2384_v62  ;;  %v2466_v34 = vmul.f32 %v2430_v49, %v2386_v50  ;;  %v2388_v19 = vmax.f32 %v2282_v1, 0.0  ;;  %v2390_v31 = vmax.f32 %v2355_v35, 0.0 }
 0x3c1   : > { %v2482_v32 = vadd.f32 %v2481_v10, %v2463_v12  ;;  %v2508_v8 = vadd.f32 %v2507_v6, %v2465_v33  ;;  %v2467_v4 = vmul.f32 %v2435_v30, %v2387_v60  ;;  %v2469_v37 = vmul.f32 %v2435_v30, %v2389_v44 }
 0x3c2   : > { %v2495_v29 = vadd.f32 %v2494_v14, %v2464_v16  ;;  %v2521_v38 = vadd.f32 %v2520_v46, %v2466_v34  ;;  %v2468_v36 = vmul.f32 %v2435_v30, %v2388_v19  ;;  %v2470_v11 = vmul.f32 %v2435_v30, %v2390_v31  ;;  %v2285_v13 = vpop.f32.mrb[44].mxu0  ;;  %v2358_v48 = vpop.f32.mrb[44].mxu1 }
 0x3c3   : > { %v2483_v63 = vadd.f32 %v2482_v32, %v2467_v4  ;;  %v2509_v41 = vadd.f32 %v2508_v8, %v2469_v37  ;;  %v2286_v45 = vadd.f32 %v2285_v13, %v4182_v43  ;;  %v2359_v27 = vadd.f32 %v2358_v48, %v4182_v43  ;;  %v2287_v20 = vpop.f32.mrb[45].mxu0  ;;  %v2360_v23 = vpop.f32.mrb[45].mxu1 }
 0x3c4   : > { %v2496_v21 = vadd.f32 %v2495_v29, %v2468_v36  ;;  %v2522_v59 = vadd.f32 %v2521_v38, %v2470_v11  ;;  %v2288_v40 = vadd.f32 %v2287_v20, %v4182_v43  ;;  %v2361_v26 = vadd.f32 %v2360_v23, %v4182_v43  ;;  %v2289_v49 = vpop.f32.mrb[46].mxu0  ;;  %v2362_v2 = vpop.f32.mrb[46].mxu1 }
 0x3c5   : > { %v2391_v42 = vmax.f32 %v2286_v45, 0.0  ;;  %v2393_v15 = vmax.f32 %v2359_v27, 0.0  ;;  %v2290_v47 = vadd.f32 %v2289_v49, %v2195_v58  ;;  %v2363_v25 = vadd.f32 %v2362_v2, %v2195_v58  ;;  %v2291_v5 = vpop.f32.mrb[47].mxu0  ;;  %v2364_v3 = vpop.f32.mrb[47].mxu1 }
 0x3c6   : > { %v2392_v18 = vmax.f32 %v2288_v40, 0.0  ;;  %v2394_v53 = vmax.f32 %v2361_v26, 0.0  ;;  %v2292_v10 = vadd.f32 %v2291_v5, %v2195_v58  ;;  %v2365_v6 = vadd.f32 %v2364_v3, %v2195_v58  ;;  %v2445_v14 = vpop.permute.xlu1 %2444  ;;  %v2535_v29 = vpop.permute.xlu0 %2534 }
 0x3c7   : > { %v2471_v57 = vmul.f32 %v2440_v24, %v2391_v42  ;;  %v2473_v22 = vmul.f32 %v2440_v24, %v2393_v15  ;;  %v2395_v17 = vmax.f32 %v2290_v47, 0.0  ;;  %v2397_v0 = vmax.f32 %v2363_v25, 0.0 }
 0x3c8   : > { %v2472_v46 = vmul.f32 %v2440_v24, %v2392_v18  ;;  %v2474_v43 = vmul.f32 %v2440_v24, %v2394_v53  ;;  %v2396_v56 = vmax.f32 %v2292_v10, 0.0  ;;  %v2398_v51 = vmax.f32 %v2365_v6, 0.0 }
 0x3c9   : > { %v2484_v52 = vadd.f32 %v2483_v63, %v2471_v57  ;;  %v2510_v7 = vadd.f32 %v2509_v41, %v2473_v22  ;;  %v2475_v9 = vmul.f32 %v2445_v14, %v2395_v17  ;;  %v2477_v39 = vmul.f32 %v2445_v14, %v2397_v0  ;;  %v4327_v41 = vld [vmem:[#allocation13_spill] sm:$0xff] }
 0x3ca   : > { %v2497_v28 = vadd.f32 %v2496_v21, %v2472_v46  ;;  %v2523_v55 = vadd.f32 %v2522_v59, %v2474_v43  ;;  %v2476_v54 = vmul.f32 %v2445_v14, %v2396_v56  ;;  %v2478_v61 = vmul.f32 %v2445_v14, %v2398_v51 }
 0x3cb   : > { %v2485_v62 = vadd.f32 %v2484_v52, %v2475_v9  ;;  %v2511_v50 = vadd.f32 %v2510_v7, %v2477_v39  ;;  %v2540_v45 = vrot.slane %v2535_v29, %v4327_v41  ;;  %v2902_v14 = vmov 1966171168  }
 0x3cc   : > { %v2498_v1 = vadd.f32 %v2497_v28, %v2476_v54  ;;  %v2524_v35 = vadd.f32 %v2523_v55, %v2478_v61  ;;  %v2580_v46 = vunpack.c.l.s4 %v2902_v14 }
 0x3cd   : > { %v2486_v12 = vrot.slane %v2485_v62, 4  ;;  %v2512_v33 = vrot.slane %v2511_v50, 4 }
 0x3ce   : > { %v2499_v60 = vrot.slane %v2498_v1, 4  ;;  %v2525_v44 = vrot.slane %v2524_v35, 4  ;;  %v2581_v52 = vunpack.c.0.s8 %v2580_v46 }
 0x3cf   : > { %v2487_v58 = vadd.f32 %v2486_v12, %v2485_v62  ;;  %v2513_v30 = vadd.f32 %v2512_v33, %v2511_v50  ;;  %v4328_v50 = vld [vmem:[#allocation11_spill] sm:$0xff] }
 0x3d0   : > { %v2500_v16 = vadd.f32 %v2499_v60, %v2498_v1  ;;  %v2526_v34 = vadd.f32 %v2525_v44, %v2524_v35  ;;  %v2584_v1 = vsub.s32 %v2581_v52, %v4328_v50 }
 0x3d1   : > { %v2488_v19 = vrot.slane %v2487_v58, 2  ;;  %v2514_v31 = vrot.slane %v2513_v30, 2 }
 0x3d2   : > { %v2501_v32 = vrot.slane %v2500_v16, 2  ;;  %v2527_v8 = vrot.slane %v2526_v34, 2 }
 0x3d3   : > { %v2489_v4 = vadd.f32 %v2488_v19, %v2487_v58  ;;  %v2515_v37 = vadd.f32 %v2514_v31, %v2513_v30  ;;  %v4329_v30 = vlaneseq }
 0x3d4   : > { %v2502_v38 = vadd.f32 %v2501_v32, %v2500_v16  ;;  %v2528_v36 = vadd.f32 %v2527_v8, %v2526_v34 }
 0x3d5   : > { %v2490_v11 = vrot.slane %v2489_v4, 1  ;;  %v2516_v13 = vrot.slane %v2515_v37, 1  ;;  %vm2604_vm0 = vcmp.lt.s32.totalorder %v4329_v30, 512 }
 0x3d6   : > { %v2503_v48 = vrot.slane %v2502_v38, 1  ;;  %v2529_v63 = vrot.slane %v2528_v36, 1 }
 0x3d7   : > { %v2491_v27 = vadd.f32 %v2490_v11, %v2489_v4  ;;  %v2517_v20 = vadd.f32 %v2516_v13, %v2515_v37 }
 0x3d8   : > { %v2504_v23 = vadd.f32 %v2503_v48, %v2502_v38  ;;  %v2530_v21 = vadd.f32 %v2529_v63, %v2528_v36 }
 0x3d9   : > { %v2541_v59 = vadd.f32 %v2540_v45, %v2491_v27  ;;  %v2543_v40 = vadd.f32 %v2540_v45, %v2517_v20 }
 0x3da   : > { %v2542_v26 = vadd.f32 %v2540_v45, %v2504_v23  ;;  %v2544_v49 = vadd.f32 %v2540_v45, %v2530_v21 }
 0x3db   : > { %v2545_v2 = vsub.f32 0.0, %v2541_v59  ;;  %v2547_v42 = vsub.f32 0.0, %v2543_v40 }
 0x3dc   : > { %v2546_v15 = vsub.f32 0.0, %v2542_v26  ;;  %v2548_v47 = vsub.f32 0.0, %v2544_v49 }
 0x3dd   : > { %v2549_v25 = vmul.f32 1.442695, %v2545_v2  ;;  %v2553_v5 = vmul.f32 1.442695, %v2547_v42 }
 0x3de   : > { %v2551_v3 = vmul.f32 1.442695, %v2546_v15  ;;  %v2555_v24 = vmul.f32 1.442695, %v2548_v47 }
 0x3df   : > { %2818 = vpow2.f32 %v2549_v25 }
 0x3e0   : > { %2820 = vpow2.f32 %v2553_v5 }
 0x3e1   : > { %2822 = vpow2.f32 %v2551_v3 }
 0x3e2   : > { %2824 = vpow2.f32 %v2555_v24 }
 0x3e9   : > { %v2819_v18 = vpop.eup %2818 }
 0x3ea   : > { %v2821_v53 = vpop.eup %2820  ;;  %v2557_v10 = vadd.f32 1.0, %v2819_v18 }
 0x3eb   : > { %v2823_v6 = vpop.eup %2822  ;;  %v2559_v57 = vadd.f32 1.0, %v2821_v53 }
 0x3ec   : > { %v2825_v22 = vpop.eup %2824  ;;  %2826 = vrcp.f32 %v2557_v10  ;;  %v2558_v17 = vadd.f32 1.0, %v2823_v6 }
 0x3ed   : > { %2828 = vrcp.f32 %v2559_v57  ;;  %v2560_v0 = vadd.f32 1.0, %v2825_v22 }
 0x3ee   : > { %2830 = vrcp.f32 %v2558_v17 }
 0x3ef   : > { %2832 = vrcp.f32 %v2560_v0 }
 0x3f6   : > { %v2827_v43 = vpop.eup %2826 }
 0x3f7   : > { %v2829_v56 = vpop.eup %2828  ;;  %v2565_v51 = vmax.f32 %v2827_v43, 0.0 }
 0x3f8   : > { %v2831_v7 = vpop.eup %2830  ;;  %v2567_v9 = vmax.f32 %v2829_v56, 0.0 }
 0x3f9   : > { %v2833_v39 = vpop.eup %2832  ;;  %v2566_v28 = vmax.f32 %v2831_v7, 0.0  ;;  %v2569_v55 = vmin.f32 %v2565_v51, 1.0 }
 0x3fa   : > { %v2568_v54 = vmax.f32 %v2833_v39, 0.0  ;;  %v2571_v61 = vmin.f32 %v2567_v9, 1.0 }
 0x3fb   : > { %v2570_v62 = vmin.f32 %v2566_v28, 1.0 }
 0x3fc   : > { %v2572_v35 = vmin.f32 %v2568_v54, 1.0 }
 0x3fd   : > { %v2577_v12 = vcombine.low %v2569_v55, %v2570_v62 }
 0x3fe   : > { %v2578_v33 = vcombine.low %v2571_v61, %v2572_v35 }
 0x3ff   : > { %v2585_v60 = vrot.slane %v2577_v12, %v2584_v1 }
 0x400   : > { %v2592_v44 = vrot.slane %v2578_v33, %v2584_v1 }
 0x402   : > { %v2593_v58 = vcombine.low %v2585_v60, %v2592_v44 }
 0x404   : > { %v2600_v16 = vrot.slane %v2593_v58, %v2584_v1 }
 0x406   : > { %2606 = vst.msk [vmem:[%s328_s15] sm:$0xf] %vm2604_vm0, %v2600_v16 }
 0x407   : > { %2849 = shalt.err (!%p2846_p3)
}
 0x408   : > { %s2850_s28 = scalar_lea.hbm %s4204_s24, 64  ;;  %s2854_s10 = scalar_lea.hbm %s4255_s9, 128 }
 0x409   : > { %p2851_p4 = scmp.ne.s32.totalorder %s4204_s24, %s2850_s28  ;;  %p2855_p9 = scmp.lt.u32.totalorder %s4204_s24, %s4255_s9 }
 0x40a   : > { %p2856_p10 = scmp.lt.u32.totalorder %s2854_s10, %s2850_s28  ;;  %p2858_p12 = scmp.lt.u32.totalorder %s2850_s28, %s4204_s24 }
 0x40b   : > { %p2852_p7 = pnand %p2851_p4, %p2995_p5 }
 0x40c   : > { %p2857_p11 = por %p2856_p10, %p2855_p9 }
 0x40d   : > { %p2853_p8 = pneg %p2852_p7 }
 0x40e   : > { %p2859_p13 = por %p2858_p12, %p2857_p11 }
 0x410   : > { %p2860_p0 = pnand %p2859_p13, %p2853_p8 }
 0x412   : > { %2863 = shalt.err (!%p2860_p0)
}
 0x413   : > { %2714 = dma.vmem_to_hbm [thread:$0]  (%p2995_p5), %s4206_s17, 64, %s4204_s24, %s2608_s22  }
 0x414 PF: > { %p2720_p1 = scmp.ge.s32.totalorder %s2898_s14, 2  ;;  %s2634_s23 = sand.u32 1, %s2886_s11  }
 0x415   : > { %s2635_s25 = scalar_lea.sflag [#allocation4], %s2634_s23 }
 0x416   : > { %p2717_p2 = pnand %p2720_p1, %p2999_p6 }
 0x418   : > { %2881 = dma.done.wait (!%p2717_p2), %s2635_s25, 64  }
 0x419   : > { %2883 = vsyncadd (!%p2717_p2), %s2635_s25, 4294967232  ;;  %p21_p3 = scmp.ge.s32.totalorder %s2982_s16, 4   ;;  %s4330_s11 = smov %s2890_s12 }
 0x41a   : > { %s4331_s12 = smov %s2894_s13  ;;  %s4332_s13 = smov %s2993_s19 }
 0x41b   : > { %s4333_s14 = smov %s2982_s16  ;;  %23 = sbr.rel (!%p21_p3) target bundleno = 6 (0x6), region = 91 }
 0x422   :  { %2640 = vsyncpa [#allocation4], 1 }
 0x423   :  { %2642 = vsyncpa [#allocation4 + $0x1], 1 }

</bundles_post_ra>
